<compile_context>
chip_gen: v7x
topology: tpu7x:2x2x1
jax: 0.10.0
libtpu: 0.0.40
codegen_flags: <defaults>
</compile_context>

<pallas_src>
import functools

import jax
import jax.numpy as jnp
import numpy as np
from jax.experimental import pallas as pl
from jax.experimental.pallas import tpu as pltpu


def mlp_kernel(x_ref, w1_ref, b1_ref, w2_ref, b2_ref, o_ref, *, total_rows, tile_rows):
    # ---- load the streamed activation tile; mask ragged last-tile rows ----
    x = x_ref[...].astype(jnp.float32)
    if total_rows % tile_rows != 0:  # static (trace-time) decision
        row = pl.program_id(0) * tile_rows + jax.lax.broadcasted_iota(
            jnp.int32, x.shape, 0
        )
        x = jnp.where(row < total_rows, x, 0.0)

    # ---- F.normalize(x.float(), dim=1) via clamped rsqrt (EUP slot) ----
    sq = jnp.sum(x * x, axis=1, keepdims=True)
    inv = jax.lax.rsqrt(jnp.maximum(sq, 1e-24))          # eps^2 = (1e-12)^2
    x_norm = (x * inv).astype(jnp.bfloat16)              # bf16 LHS for the MXU

    # ---- Linear(dim_in, dim_in) + ReLU (bf16 inputs, f32 accumulation) ----
    h = jnp.dot(x_norm, w1_ref[...], preferred_element_type=jnp.float32)
    h = jnp.maximum(h + b1_ref[...], 0.0).astype(jnp.bfloat16)

    # ---- Linear(dim_in, feat_dim) ----
    out = jnp.dot(h, w2_ref[...], preferred_element_type=jnp.float32) + b2_ref[...]
    o_ref[...] = out.astype(o_ref.dtype)


def _round_up(n, m):
    return ((n + m - 1) // m) * m


def _pad2d(a, rows, cols):
    r, c = a.shape
    if r == rows and c == cols:
        return a
    return jnp.pad(a, ((0, rows - r), (0, cols - c)))


def mlp_forward(x, w1_t, b1, w2_t, b2, *, tm=512, out_dtype=jnp.float32):
    """x: (B, dim_in) in f32 or bf16. w1_t: (dim_in, dim_in), w2_t: (dim_in, feat_dim).

    Weights are stored pre-transposed as (in, out) so the kernel runs plain
    row-major MXU matmuls; they are padded/cast to bf16 once here (f32
    accumulation in the kernel preserves accuracy).
    """
    B, D = x.shape
    F_ = w2_t.shape[1]

    Dp = _round_up(D, 128)
    Fp = _round_up(F_, 128)

    # Tile: large enough to amortize per-step overhead / feed the 256-wide MXU,
    # but >=2 grid steps whenever the batch allows it (v7x megacore sharding).
    tm_eff = int(min(tm, max(8, _round_up(-(-B // 2), 8))))
    grid = (pl.cdiv(B, tm_eff),)

    # Only the feature axis of the activation stream is padded (no-op when the
    # dims are already 128-aligned); the batch axis is handled in-kernel.
    xp = x if D == Dp else jnp.pad(x, ((0, 0), (0, Dp - D)))
    w1p = _pad2d(w1_t.astype(jnp.float32), Dp, Dp).astype(jnp.bfloat16)
    w2p = _pad2d(w2_t.astype(jnp.float32), Dp, Fp).astype(jnp.bfloat16)
    b1p = _pad2d(b1.reshape(1, D).astype(jnp.float32), 1, Dp)
    b2p = _pad2d(b2.reshape(1, F_).astype(jnp.float32), 1, Fp)

    kernel = functools.partial(mlp_kernel, total_rows=B, tile_rows=tm_eff)

    x_bytes = int(xp.dtype.itemsize)
    o_bytes = int(jnp.dtype(out_dtype).itemsize)

    def build(single_buffer_weights):
        wmode = (
            dict(pipeline_mode=pl.Buffered(1)) if single_buffer_weights else {}
        )
        wfac = 1 if single_buffer_weights else 2
        weight_bytes = wfac * ((Dp * Dp + Dp * Fp) * 2 + 8 * (Dp + Fp) * 4)
        act_bytes = 2 * tm_eff * (Dp * x_bytes + Fp * o_bytes)  # double-buffered
        vmem_limit = int(
            min(max(weight_bytes + act_bytes + (8 << 20), 16 << 20), 100 << 20)
        )
        return pl.pallas_call(
            kernel,
            out_shape=jax.ShapeDtypeStruct((B, Fp), out_dtype),
            grid_spec=pltpu.PrefetchScalarGridSpec(
                num_scalar_prefetch=0,
                grid=grid,
                in_specs=[
                    pl.BlockSpec((tm_eff, Dp), lambda i: (i, 0)),        # streamed x
                    pl.BlockSpec((Dp, Dp), lambda i: (0, 0), **wmode),   # resident w1
                    pl.BlockSpec((1, Dp), lambda i: (0, 0), **wmode),    # resident b1
                    pl.BlockSpec((Dp, Fp), lambda i: (0, 0), **wmode),   # resident w2
                    pl.BlockSpec((1, Fp), lambda i: (0, 0), **wmode),    # resident b2
                ],
                out_specs=pl.BlockSpec((tm_eff, Fp), lambda i: (i, 0)),
            ),
            compiler_params=pltpu.CompilerParams(
                dimension_semantics=("parallel",),   # megacore-shardable on v7x
                vmem_limit_bytes=vmem_limit,
            ),
        )

    try:
        out = build(True)(xp, w1p, b1p, w2p, b2p)
    except Exception:
        # Fallback for jax versions without BlockSpec(pipeline_mode=...):
        # default double-buffered weights (extra VMEM only, same semantics).
        out = build(False)(xp, w1p, b1p, w2p, b2p)

    return out if Fp == F_ else out[:, :F_]


def _reference(x, w1_t, b1, w2_t, b2):
    xf = x.astype(jnp.float32)
    nrm = jnp.sqrt(jnp.sum(xf * xf, axis=1, keepdims=True))
    xn = xf / jnp.maximum(nrm, 1e-12)
    h = jnp.maximum(xn @ w1_t + b1, 0.0)
    return h @ w2_t + b2


if __name__ == "__main__":
    # Small but MXU/lane-aligned shapes consistent with MLP(head='mlp').
    batch, dim_in, feat_dim = 256, 256, 128

    key = jax.random.PRNGKey(0)
    kx, k1, kb1, k2, kb2 = jax.random.split(key, 5)

    x = jax.random.normal(kx, (batch, dim_in), dtype=jnp.float32)

    # PyTorch-like uniform init, bound 1/sqrt(fan_in).
    bound1 = 1.0 / np.sqrt(dim_in)
    w1_t = jax.random.uniform(k1, (dim_in, dim_in), jnp.float32, -bound1, bound1)
    b1 = jax.random.uniform(kb1, (dim_in,), jnp.float32, -bound1, bound1)
    w2_t = jax.random.uniform(k2, (dim_in, feat_dim), jnp.float32, -bound1, bound1)
    b2 = jax.random.uniform(kb2, (feat_dim,), jnp.float32, -bound1, bound1)

    # Aligned path: no activation padding, no output slice, grid of 2 tiles.
    out = mlp_forward(x, w1_t, b1, w2_t, b2)
    jax.block_until_ready(out)
    ref = _reference(x, w1_t, b1, w2_t, b2)
    # bf16 matmul inputs with f32 accumulation: loosen tolerance vs pure-f32 ref.
    np.testing.assert_allclose(np.asarray(out), np.asarray(ref), atol=1e-2, rtol=1e-2)

    # bf16 activation stream (halves x DMA bytes); compare vs ref on rounded x.
    x_bf = x.astype(jnp.bfloat16)
    out_bf = mlp_forward(x_bf, w1_t, b1, w2_t, b2)
    jax.block_until_ready(out_bf)
    ref_bf = _reference(x_bf.astype(jnp.float32), w1_t, b1, w2_t, b2)
    np.testing.assert_allclose(np.asarray(out_bf), np.asarray(ref_bf), atol=1e-2, rtol=1e-2)

    # Ragged / unaligned path: batch not a tile multiple, features not 128-aligned.
    b2n, d2, f2 = 10, 96, 40
    x_s = jax.random.normal(kx, (b2n, d2), dtype=jnp.float32)
    w1_s = jax.random.uniform(k1, (d2, d2), jnp.float32, -0.1, 0.1)
    b1_s = jax.random.uniform(kb1, (d2,), jnp.float32, -0.1, 0.1)
    w2_s = jax.random.uniform(k2, (d2, f2), jnp.float32, -0.1, 0.1)
    b2_s = jax.random.uniform(kb2, (f2,), jnp.float32, -0.1, 0.1)
    out_s = mlp_forward(x_s, w1_s, b1_s, w2_s, b2_s)
    jax.block_until_ready(out_s)
    ref_s = _reference(x_s, w1_s, b1_s, w2_s, b2_s)
    np.testing.assert_allclose(np.asarray(out_s), np.asarray(ref_s), atol=1e-2, rtol=1e-2)

    print("KERNEL_OK")
</pallas_src>

<mosaic_0001>
module attributes {stable_mosaic.version = 11 : i64} {
  func.func @mlp_kernel(%arg0: i32, %arg1: memref<128x256xf32, #tpu.memory_space<vmem>>, %arg2: memref<256x256xbf16, #tpu.memory_space<vmem>>, %arg3: memref<1x256xf32, #tpu.memory_space<vmem>>, %arg4: memref<256x128xbf16, #tpu.memory_space<vmem>>, %arg5: memref<1x128xf32, #tpu.memory_space<vmem>>, %arg6: memref<128x128xf32, #tpu.memory_space<vmem>>) attributes {dimension_semantics = [#tpu.dimension_semantics<parallel>], iteration_bounds = array<i64: 2>, scalar_prefetch = 0 : i64, scratch_operands = 0 : i64, tpu.core_type = #tpu.core_type<tc>, window_params = [{transform_indices = @transform_0, window_bounds = array<i64: 128, 256>}, {pipeline_mode = #tpu.pipeline_mode<synchronous>, transform_indices = @transform_1, window_bounds = array<i64: 256, 256>}, {pipeline_mode = #tpu.pipeline_mode<synchronous>, transform_indices = @transform_2, window_bounds = array<i64: 1, 256>}, {pipeline_mode = #tpu.pipeline_mode<synchronous>, transform_indices = @transform_3, window_bounds = array<i64: 256, 128>}, {pipeline_mode = #tpu.pipeline_mode<synchronous>, transform_indices = @transform_4, window_bounds = array<i64: 1, 128>}, {transform_indices = @transform_5, window_bounds = array<i64: 128, 128>}]} {
    %c0 = arith.constant 0 : index
    %c0_0 = arith.constant 0 : index
    %0 = vector.load %arg1[%c0, %c0_0] : memref<128x256xf32, #tpu.memory_space<vmem>>, vector<128x256xf32>
    %1 = arith.mulf %0, %0 : vector<128x256xf32>
    %cst = arith.constant dense<0.000000e+00> : vector<128xf32>
    %2 = vector.multi_reduction <add>, %1, %cst [1] : vector<128x256xf32> to vector<128xf32>
    %3 = vector.shape_cast %2 : vector<128xf32> to vector<128x1xf32>
    %cst_1 = arith.constant 1.000000e-24 : f32
    %4 = vector.broadcast %cst_1 : f32 to vector<128x1xf32>
    %5 = arith.maximumf %3, %4 : vector<128x1xf32>
    %6 = math.rsqrt %5 : vector<128x1xf32>
    %7 = vector.broadcast %6 : vector<128x1xf32> to vector<128x256xf32>
    %8 = arith.mulf %0, %7 : vector<128x256xf32>
    %9 = arith.truncf %8 : vector<128x256xf32> to vector<128x256xbf16>
    %c0_2 = arith.constant 0 : index
    %c0_3 = arith.constant 0 : index
    %10 = vector.load %arg2[%c0_2, %c0_3] : memref<256x256xbf16, #tpu.memory_space<vmem>>, vector<256x256xbf16>
    %cst_4 = arith.constant dense<0.000000e+00> : vector<128x256xf32>
    %11 = tpu.matmul %9, %10, %cst_4 {dimension_numbers = #tpu.dot_dimension_numbers<[1], [0], [0], [1], [0, 0, 1, 1], [], []>} : vector<128x256xbf16>, vector<256x256xbf16>, vector<128x256xf32> -> vector<128x256xf32>
    %c0_5 = arith.constant 0 : index
    %c0_6 = arith.constant 0 : index
    %12 = vector.load %arg3[%c0_5, %c0_6] : memref<1x256xf32, #tpu.memory_space<vmem>>, vector<1x256xf32>
    %13 = vector.broadcast %12 : vector<1x256xf32> to vector<128x256xf32>
    %14 = arith.addf %11, %13 : vector<128x256xf32>
    %cst_7 = arith.constant 0.000000e+00 : f32
    %15 = vector.broadcast %cst_7 : f32 to vector<128x256xf32>
    %16 = arith.maximumf %14, %15 : vector<128x256xf32>
    %17 = arith.truncf %16 : vector<128x256xf32> to vector<128x256xbf16>
    %c0_8 = arith.constant 0 : index
    %c0_9 = arith.constant 0 : index
    %18 = vector.load %arg4[%c0_8, %c0_9] : memref<256x128xbf16, #tpu.memory_space<vmem>>, vector<256x128xbf16>
    %cst_10 = arith.constant dense<0.000000e+00> : vector<128x128xf32>
    %19 = tpu.matmul %17, %18, %cst_10 {dimension_numbers = #tpu.dot_dimension_numbers<[1], [0], [0], [1], [0, 0, 1, 1], [], []>} : vector<128x256xbf16>, vector<256x128xbf16>, vector<128x128xf32> -> vector<128x128xf32>
    %c0_11 = arith.constant 0 : index
    %c0_12 = arith.constant 0 : index
    %20 = vector.load %arg5[%c0_11, %c0_12] : memref<1x128xf32, #tpu.memory_space<vmem>>, vector<1x128xf32>
    %21 = vector.broadcast %20 : vector<1x128xf32> to vector<128x128xf32>
    %22 = arith.addf %19, %21 : vector<128x128xf32>
    %c0_13 = arith.constant 0 : index
    %c0_14 = arith.constant 0 : index
    %23 = vector.load %arg6[%c0_13, %c0_14] : memref<128x128xf32, #tpu.memory_space<vmem>>, vector<128x128xf32>
    tpu.vector_store %arg6[%c0_13, %c0_14], %22 {strides = array<i32>} : memref<128x128xf32, #tpu.memory_space<vmem>>, vector<128x128xf32>,
    return
  }
  func.func @transform_0(%arg0: i32) -> (i32, i32) {
    %c0_i32 = arith.constant 0 : i32
    %c0_i32_0 = arith.constant 0 : i32
    return %arg0, %c0_i32 : i32, i32
  }
  func.func @transform_1(%arg0: i32) -> (i32, i32) {
    %c0_i32 = arith.constant 0 : i32
    %c0_i32_0 = arith.constant 0 : i32
    %c0_i32_1 = arith.constant 0 : i32
    return %c0_i32, %c0_i32_0 : i32, i32
  }
  func.func @transform_2(%arg0: i32) -> (i32, i32) {
    %c0_i32 = arith.constant 0 : i32
    %c0_i32_0 = arith.constant 0 : i32
    %c0_i32_1 = arith.constant 0 : i32
    return %c0_i32, %c0_i32_0 : i32, i32
  }
  func.func @transform_3(%arg0: i32) -> (i32, i32) {
    %c0_i32 = arith.constant 0 : i32
    %c0_i32_0 = arith.constant 0 : i32
    %c0_i32_1 = arith.constant 0 : i32
    return %c0_i32, %c0_i32_0 : i32, i32
  }
  func.func @transform_4(%arg0: i32) -> (i32, i32) {
    %c0_i32 = arith.constant 0 : i32
    %c0_i32_0 = arith.constant 0 : i32
    %c0_i32_1 = arith.constant 0 : i32
    return %c0_i32, %c0_i32_0 : i32, i32
  }
  func.func @transform_5(%arg0: i32) -> (i32, i32) {
    %c0_i32 = arith.constant 0 : i32
    %c0_i32_0 = arith.constant 0 : i32
    return %arg0, %c0_i32 : i32, i32
  }
}

module attributes {stable_mosaic.version = 11 : i64} {
  func.func @mlp_kernel(%arg0: i32, %arg1: memref<128x256xf32, #tpu.memory_space<vmem>>, %arg2: memref<256x256xbf16, #tpu.memory_space<vmem>>, %arg3: memref<1x256xf32, #tpu.memory_space<vmem>>, %arg4: memref<256x128xbf16, #tpu.memory_space<vmem>>, %arg5: memref<1x128xf32, #tpu.memory_space<vmem>>, %arg6: memref<128x128xf32, #tpu.memory_space<vmem>>) attributes {dimension_semantics = [#tpu.dimension_semantics<parallel>], iteration_bounds = array<i64: 2>, scalar_prefetch = 0 : i64, scratch_operands = 0 : i64, tpu.core_type = #tpu.core_type<tc>, window_params = [{transform_indices = @transform_0, window_bounds = array<i64: 128, 256>}, {pipeline_mode = #tpu.pipeline_mode<synchronous>, transform_indices = @transform_1, window_bounds = array<i64: 256, 256>}, {pipeline_mode = #tpu.pipeline_mode<synchronous>, transform_indices = @transform_2, window_bounds = array<i64: 1, 256>}, {pipeline_mode = #tpu.pipeline_mode<synchronous>, transform_indices = @transform_3, window_bounds = array<i64: 256, 128>}, {pipeline_mode = #tpu.pipeline_mode<synchronous>, transform_indices = @transform_4, window_bounds = array<i64: 1, 128>}, {transform_indices = @transform_5, window_bounds = array<i64: 128, 128>}]} {
    %c0 = arith.constant 0 : index
    %c0_0 = arith.constant 0 : index
    %0 = vector.load %arg1[%c0, %c0_0] : memref<128x256xf32, #tpu.memory_space<vmem>>, vector<128x256xf32>
    %1 = arith.mulf %0, %0 : vector<128x256xf32>
    %cst = arith.constant dense<0.000000e+00> : vector<128xf32>
    %2 = vector.multi_reduction <add>, %1, %cst [1] : vector<128x256xf32> to vector<128xf32>
    %3 = vector.shape_cast %2 : vector<128xf32> to vector<128x1xf32>
    %cst_1 = arith.constant 1.000000e-24 : f32
    %4 = vector.broadcast %cst_1 : f32 to vector<128x1xf32>
    %5 = arith.maximumf %3, %4 : vector<128x1xf32>
    %6 = math.rsqrt %5 : vector<128x1xf32>
    %7 = vector.broadcast %6 : vector<128x1xf32> to vector<128x256xf32>
    %8 = arith.mulf %0, %7 : vector<128x256xf32>
    %9 = arith.truncf %8 : vector<128x256xf32> to vector<128x256xbf16>
    %c0_2 = arith.constant 0 : index
    %c0_3 = arith.constant 0 : index
    %10 = vector.load %arg2[%c0_2, %c0_3] : memref<256x256xbf16, #tpu.memory_space<vmem>>, vector<256x256xbf16>
    %cst_4 = arith.constant dense<0.000000e+00> : vector<128x256xf32>
    %11 = tpu.matmul %9, %10, %cst_4 {dimension_numbers = #tpu.dot_dimension_numbers<[1], [0], [0], [1], [0, 0, 1, 1], [], []>} : vector<128x256xbf16>, vector<256x256xbf16>, vector<128x256xf32> -> vector<128x256xf32>
    %c0_5 = arith.constant 0 : index
    %c0_6 = arith.constant 0 : index
    %12 = vector.load %arg3[%c0_5, %c0_6] : memref<1x256xf32, #tpu.memory_space<vmem>>, vector<1x256xf32>
    %13 = vector.broadcast %12 : vector<1x256xf32> to vector<128x256xf32>
    %14 = arith.addf %11, %13 : vector<128x256xf32>
    %cst_7 = arith.constant 0.000000e+00 : f32
    %15 = vector.broadcast %cst_7 : f32 to vector<128x256xf32>
    %16 = arith.maximumf %14, %15 : vector<128x256xf32>
    %17 = arith.truncf %16 : vector<128x256xf32> to vector<128x256xbf16>
    %c0_8 = arith.constant 0 : index
    %c0_9 = arith.constant 0 : index
    %18 = vector.load %arg4[%c0_8, %c0_9] : memref<256x128xbf16, #tpu.memory_space<vmem>>, vector<256x128xbf16>
    %cst_10 = arith.constant dense<0.000000e+00> : vector<128x128xf32>
    %19 = tpu.matmul %17, %18, %cst_10 {dimension_numbers = #tpu.dot_dimension_numbers<[1], [0], [0], [1], [0, 0, 1, 1], [], []>} : vector<128x256xbf16>, vector<256x128xbf16>, vector<128x128xf32> -> vector<128x128xf32>
    %c0_11 = arith.constant 0 : index
    %c0_12 = arith.constant 0 : index
    %20 = vector.load %arg5[%c0_11, %c0_12] : memref<1x128xf32, #tpu.memory_space<vmem>>, vector<1x128xf32>
    %21 = vector.broadcast %20 : vector<1x128xf32> to vector<128x128xf32>
    %22 = arith.addf %19, %21 : vector<128x128xf32>
    %c0_13 = arith.constant 0 : index
    %c0_14 = arith.constant 0 : index
    %23 = vector.load %arg6[%c0_13, %c0_14] : memref<128x128xf32, #tpu.memory_space<vmem>>, vector<128x128xf32>
    tpu.vector_store %arg6[%c0_13, %c0_14], %22 {strides = array<i32>} : memref<128x128xf32, #tpu.memory_space<vmem>>, vector<128x128xf32>,
    return
  }
  func.func @transform_0(%arg0: i32) -> (i32, i32) {
    %c0_i32 = arith.constant 0 : i32
    %c0_i32_0 = arith.constant 0 : i32
    return %arg0, %c0_i32 : i32, i32
  }
  func.func @transform_1(%arg0: i32) -> (i32, i32) {
    %c0_i32 = arith.constant 0 : i32
    %c0_i32_0 = arith.constant 0 : i32
    %c0_i32_1 = arith.constant 0 : i32
    return %c0_i32, %c0_i32_0 : i32, i32
  }
  func.func @transform_2(%arg0: i32) -> (i32, i32) {
    %c0_i32 = arith.constant 0 : i32
    %c0_i32_0 = arith.constant 0 : i32
    %c0_i32_1 = arith.constant 0 : i32
    return %c0_i32, %c0_i32_0 : i32, i32
  }
  func.func @transform_3(%arg0: i32) -> (i32, i32) {
    %c0_i32 = arith.constant 0 : i32
    %c0_i32_0 = arith.constant 0 : i32
    %c0_i32_1 = arith.constant 0 : i32
    return %c0_i32, %c0_i32_0 : i32, i32
  }
  func.func @transform_4(%arg0: i32) -> (i32, i32) {
    %c0_i32 = arith.constant 0 : i32
    %c0_i32_0 = arith.constant 0 : i32
    %c0_i32_1 = arith.constant 0 : i32
    return %c0_i32, %c0_i32_0 : i32, i32
  }
  func.func @transform_5(%arg0: i32) -> (i32, i32) {
    %c0_i32 = arith.constant 0 : i32
    %c0_i32_0 = arith.constant 0 : i32
    return %arg0, %c0_i32 : i32, i32
  }
}

</mosaic_0001>

<bundles_post_ra>
// kernel: tpu_custom_call.1
= control target key start
LH: loop header
LB: loop body
LE: loop exit
PB: predicated region body
PF: predicated region fallthrough
CT: control target
= control target key end

     0   :  { %10 = vsyncpa [#allocation3], 0  ;;  %s2201_s0 = inlined_call_operand.hbm [shape: f32[256,256], index: 0, kind: input, shape index: {}]   ;;  %s2202_s1 = inlined_call_operand.hbm [shape: bf16[256,256], index: 1, kind: input, shape index: {}]   ;;  %s2203_s2 = inlined_call_operand.vmem [shape: f32[1,256], index: 2, kind: input, shape index: {}]   ;;  %s2204_s3 = inlined_call_operand.hbm [shape: bf16[256,128], index: 3, kind: input, shape index: {}]   ;;  %s2205_s4 = inlined_call_operand.vmem [shape: f32[1,128], index: 4, kind: input, shape index: {}]   ;;  %s2206_s5 = inlined_call_operand.hbm [shape: f32[256,128], index: 5, kind: output, shape index: {}]  }
   0x1   :  { %12 = vsyncpa [#allocation3 + $0x1], 0 }
   0x2   :  { %13 = vsyncpa [#allocation6], 0 }
   0x3   :  { %14 = vsyncpa [#allocation4], 0 }
   0x4   :  { %16 = vsyncpa [#allocation4 + $0x1], 0  ;;  %s1693_s18 = smov 0   ;;  %s1695_s19 = smov 0  }
   0x5   :  { %s1697_s20 = smov 0   ;;  %s1699_s21 = smov 0  }
   0x6 LB: > { %s1714_s22 = sadd.s32 4294967295, %s1649_s21   ;;  %s1187_s23 = sadd.s32 4294967294, %s1649_s21   ;;  %s1649_s21 = sphi %s1699_s21, %s2226_s21   ;;  %s1645_s20 = sphi %s1697_s20, %s2225_s20   ;;  %s1641_s19 = sphi %s1695_s19, %s2224_s19   ;;  %s1637_s18 = sphi %s1693_s18, %s2223_s18  }
   0x7   : > { %p42_p0 = scmp.ne.s32.totalorder %s1641_s19, %s1637_s18  ;;  %p2207_p1 = scmp.eq.s32.totalorder %s1714_s22, 0 }
   0x8   : > { %p156_p3 = scmp.eq.s32.totalorder %s1187_s23, 1  ;;  %p1188_p5 = scmp.ge.s32.totalorder %s1649_s21, 1 }
   0x9   : > { %p1723_p4 = por %p2207_p1, %p42_p0  ;;  %p163_p7 = scmp.lt.s32.totalorder %s1649_s21, 3 }
   0xa   : > { %p1728_p6 = por %p156_p3, %p42_p0  ;;  %s1651_s27 = smov [#allocation5]  }
   0xb   : > { %s2210_s24 = scalar_select %p1723_p4, 1, 0 }
   0xc   : > { %s2211_s25 = scalar_select %p1728_p6, 1, 0 }
   0xd   : > { %p1733_p8 = pnand %p1188_p5, %p163_p7  ;;  %s175_s28 = sshll.u32 %s1651_s27, 4  ;;  %s1737_s28 = int_to_ptr.vmem [resolvable:$true] %s175_s28 }
   0xe   : > { %s1652_s30 = smov [#allocation7]   ;;  %s1493_s9 = scalar_lea.hbm %s2202_s1, 4096 }
   0xf   : > { %p1334_p9 = pneg %p1733_p8  ;;  %s191_s6 = sshll.u32 %s1652_s30, 4  ;;  %s1748_s6 = int_to_ptr.vmem [resolvable:$true] %s191_s6 }
  0x10   : > { %p1494_p12 = scmp.ne.s32.totalorder %s2202_s1, %s1493_s9  ;;  %p1500_p5 = scmp.lt.u32.totalorder %s1493_s9, %s2202_s1 }
  0x11   : > { %p1744_p11 = pnand %p1334_p9, %p2207_p1 }
  0x13   : > { %p1495_p13 = pneg %p1744_p11 }
  0x15   : > { %p1496_p0 = pnand %p1495_p13, %p1494_p12 }
  0x17   : > { %p1497_p3 = pneg %p1496_p0 }
  0x19   : > { %p1502_p7 = pnand %p1500_p5, %p1497_p3 }
  0x1b   : > { %1505 = shalt.err (!%p1502_p7)
}
  0x1c   : > { %s1506_s14 = scalar_lea.vmem %s1737_s28, 4096  ;;  %p1514_p2 = scmp.lt.s32.totalorder %s1737_s28, %s1737_s28 }
  0x1d   : > { %p1507_p9 = scmp.ne.s32.totalorder %s1737_s28, %s1506_s14  ;;  %p1515_p12 = scmp.lt.s32.totalorder %s1506_s14, %s1506_s14 }
  0x1f   : > { %p1509_p10 = pnand %p1507_p9, %p1495_p13  ;;  %p1516_p0 = por %p1515_p12, %p1514_p2 }
  0x21   : > { %p1510_p1 = pneg %p1509_p10 }
  0x23   : > { %p1517_p6 = pnand %p1516_p0, %p1510_p1 }
  0x25   : > { %1520 = shalt.err (!%p1517_p6)
}
  0x26   : > { %s1653_s15 = smov 128   ;;  %s1654_s16 = smov 8  }
  0x27   : > { %1337 = dma.hbm_to_vmem [thread:$0]  (!%p1744_p11), %s2202_s1, 4096, %s1737_s28, [#allocation6], %s1653_s15, %s1653_s15, %s1654_s16  }
  0x28   : > { %s1521_s7 = scalar_lea.hbm %s2204_s3, 2048 }
  0x29   : > { %p1522_p2 = scmp.ne.s32.totalorder %s2204_s3, %s1521_s7  ;;  %p1528_p10 = scmp.lt.u32.totalorder %s1521_s7, %s2204_s3 }
  0x2b   : > { %p1524_p1 = pnand %p1522_p2, %p1495_p13 }
  0x2d   : > { %p1525_p6 = pneg %p1524_p1 }
  0x2f   : > { %p1530_p3 = pnand %p1528_p10, %p1525_p6 }
  0x31   : > { %1533 = shalt.err (!%p1530_p3)
}
  0x32   : > { %s1534_s28 = scalar_lea.vmem %s1748_s6, 2048  ;;  %p1542_p12 = scmp.lt.s32.totalorder %s1748_s6, %s1748_s6 }
  0x33   : > { %p1535_p5 = scmp.ne.s32.totalorder %s1748_s6, %s1534_s28  ;;  %p1543_p0 = scmp.lt.s32.totalorder %s1534_s28, %s1534_s28 }
  0x35   : > { %p1537_p7 = pnand %p1535_p5, %p1495_p13  ;;  %p1544_p2 = por %p1543_p0, %p1542_p12 }
  0x37   : > { %p1538_p9 = pneg %p1537_p7 }
  0x39   : > { %p1545_p1 = pnand %p1544_p2, %p1538_p9 }
  0x3b   : > { %1548 = shalt.err (!%p1545_p1)
}
  0x3c   : > { %s1655_s12 = smov 64   ;;  %s1656_s13 = smov 4  }
  0x3d   : > { %1340 = dma.hbm_to_vmem [thread:$0]  (!%p1744_p11), %s2204_s3, 2048, %s1748_s6, [#allocation6], %s1655_s12, %s1655_s12, %s1656_s13  }
  0x3e   : > { %s1803_s16 = sadd.s32 1, %s1649_s21   ;;  %s29_s23 = sadd.s32 1, %s1645_s20 }
  0x3f   : > { %s26_s17 = ssub.s32 %s1649_s21, %s1803_s16  ;;  %p36_p6 = scmp.ne.s32.totalorder %s1645_s20, %s1641_s19 }
  0x40   : > { %p27_p13 = scmp.eq.s32.totalorder %s26_s17, 0  ;;  %p37_p10 = scmp.eq.s32.totalorder %s1649_s21, 0 }
  0x41   : > { %p2214_p5 = scmp.eq.s32.totalorder %s1714_s22, 1  ;;  %p1351_p9 = scmp.lt.s32.totalorder %s1649_s21, 2 }
  0x42   : > { %s1812_s27 = scalar_select %p27_p13, %s1645_s20, %s29_s23  }
  0x43   : > { %p38_p3 = por %p37_p10, %p36_p6  ;;  %p1816_p7 = por %p2214_p5, %p36_p6 }
  0x44   : > { %s208_s29 = sand.u32 1, %s1645_s20   ;;  %s1256_s6 = sshll.u32 %s1649_s21, 12 }
  0x45   : > { %s2215_s30 = scalar_select %p1816_p7, 1, 0 }
  0x46   : > { %s1192_s7 = sshll.u32 %s208_s29, 8  ;;  %s1826_s10 = scalar_lea.hbm %s2201_s0, %s1256_s6 }
  0x47   : > { %s212_s11 = scalar_lea.vmem [#allocation2], %s1192_s7  ;;  %p1830_p11 = pnand %p1351_p9, %p38_p3 }
  0x48   : > { %s220_s28 = sshll.u32 %s212_s11, 4  ;;  %s1834_s13 = scalar_lea.sflag [#allocation3], %s208_s29  ;;  %s1828_s28 = int_to_ptr.vmem [resolvable:$true] %s220_s28 }
  0x49   : > { %s1549_s14 = scalar_lea.hbm %s1826_s10, 4096  ;;  %p1551_p0 = pneg %p1830_p11 }
  0x4a   : > { %p1550_p12 = scmp.ne.s32.totalorder %s1826_s10, %s1549_s14  ;;  %s1554_s23 = scalar_lea.hbm %s2201_s0, 8192 }
  0x4b   : > { %p1555_p13 = scmp.lt.u32.totalorder %s1826_s10, %s2201_s0  ;;  %p1556_p6 = scmp.lt.u32.totalorder %s1554_s23, %s1549_s14 }
  0x4c   : > { %p1552_p2 = pnand %p1551_p0, %p1550_p12  ;;  %p1558_p3 = scmp.lt.u32.totalorder %s1549_s14, %s1826_s10 }
  0x4d   : > { %p1557_p10 = por %p1556_p6, %p1555_p13 }
  0x4e   : > { %p1553_p1 = pneg %p1552_p2 }
  0x4f   : > { %p1559_p5 = por %p1558_p3, %p1557_p10 }
  0x51   : > { %p1560_p9 = pnand %p1559_p5, %p1553_p1 }
  0x53   : > { %1563 = shalt.err (!%p1560_p9)
}
  0x54   : > { %s1564_s29 = scalar_lea.vmem %s1828_s28, 4096  ;;  %s1657_s8 = smov [#allocation2]  }
  0x55   : > { %p1565_p12 = scmp.ne.s32.totalorder %s1828_s28, %s1564_s29  ;;  %s1569_s9 = sshll.u32 %s1657_s8, 4  ;;  %s1570_s9 = int_to_ptr.vmem [resolvable:$false] %s1569_s9 }
  0x56   : > { %s1571_s11 = scalar_lea.vmem %s1570_s9, 8192  ;;  %p1572_p4 = scmp.lt.s32.totalorder %s1828_s28, %s1570_s9 }
  0x57   : > { %p1567_p2 = pnand %p1565_p12, %p1551_p0  ;;  %p1573_p13 = scmp.lt.s32.totalorder %s1571_s11, %s1564_s29 }
  0x59   : > { %p1568_p7 = pneg %p1567_p2  ;;  %p1574_p6 = por %p1573_p13, %p1572_p4 }
  0x5b   : > { %p1575_p10 = pnand %p1574_p6, %p1568_p7 }
  0x5d   : > { %1578 = shalt.err (!%p1575_p10)
}
  0x5e   : > { %s1658_s14 = smov 256   ;;  %s1659_s15 = smov 16  }
  0x5f   : > { %1344 = dma.hbm_to_vmem [thread:$0]  (!%p1830_p11), %s1826_s10, 4096, %s1828_s28, %s1834_s13, %s1658_s14, %s1658_s14, %s1659_s15  }
  0x60   : > { %232 = sbr.rel (%p1733_p8) target bundleno = 788 (0x314), region = 40  ;;  %s1865_s17 = sand.u32 (!%p1733_p8), 1, %s1641_s19  }
  0x61   : > { %s1197_s23 = sshll.u32 (!%p1733_p8), %s1865_s17, 8  ;;  %s235_s7 = scalar_lea.sflag (!%p1733_p8), [#allocation3], %s1865_s17 }
  0x62   : > { %s1869_s6 = scalar_lea.vmem (!%p1733_p8), [#allocation2], %s1197_s23  ;;  %p2217_p4 = scmp.ne.s32.totalorder (!%p1733_p8), %s2210_s24, 0 }
  0x67   : > { %1624 = dma.done.wait (%p2217_p4), %s235_s7, 4096  }
  0x68   : > { %1626 = vsyncadd (%p2217_p4), %s235_s7, 4294963200  ;;  %p2218_p7 = scmp.eq.s32.totalorder %s1714_s22, 0 }
  0x6a   : > { %1628 = dma.done.wait (%p2218_p7), [#allocation6], 6144   ;;  %p2219_p8 = pmov %p2218_p7 }
  0x6b   : > { %v1880_v0 = vld [vmem:[%s1869_s6] sm:$0xff]  ;;  %v1883_v1 = vld [vmem:[%s1869_s6 + $0x8] sm:$0xff]  ;;  %v1898_v7 = vld [vmem:[%s1869_s6 + $0x10] sm:$0xff]  ;;  %s1200_s10 = sshll.u32 %s1865_s17, 7  ;;  %s1257_s29 = sshll.u32 %s1714_s22, 11 }
  0x6c   : > { %1630 = vsyncadd (%p2219_p8), [#allocation6], 4294961152  ;;  %v1886_v2 = vld [vmem:[%s1869_s6 + $0x20] sm:$0xff]  ;;  %v308_v3 = vmul.f32 %v1880_v0, %v1880_v0  ;;  %v309_v4 = vmul.f32 %v1883_v1, %v1883_v1  ;;  %v1893_v5 = vld [vmem:[%s1869_s6 + $0x28] sm:$0xff]  ;;  %v310_v10 = vmul.f32 %v1898_v7, %v1898_v7  ;;  %s2117_s13 = scalar_lea.vmem [#allocation8], %s1200_s10  ;;  %s2152_s14 = scalar_lea.hbm %s2206_s5, %s1257_s29 }
  0x6d   : > { %v312_v6 = vmul.f32 %v1886_v2, %v1886_v2  ;;  %v1901_v8 = vld [vmem:[%s1869_s6 + $0x18] sm:$0xff]  ;;  %v313_v9 = vmul.f32 %v1893_v5, %v1893_v5  ;;  %v1910_v12 = vld [vmem:[%s1869_s6 + $0x30] sm:$0xff]  ;;  %v1926_v19 = vld [vmem:[%s1869_s6 + $0x40] sm:$0xff]  ;;  %s1095_s8 = sshll.u32 %s2117_s13, 4  ;;  %s1082_s22 = scalar_lea.sflag [#allocation4], %s1865_s17  ;;  %s2154_s8 = int_to_ptr.vmem [resolvable:$true] %s1095_s8 }
  0x6e   : > { %v311_v11 = vmul.f32 %v1901_v8, %v1901_v8  ;;  %v1913_v13 = vld [vmem:[%s1869_s6 + $0x38] sm:$0xff]  ;;  %v1916_v14 = vld [vmem:[%s1869_s6 + $0x50] sm:$0xff]  ;;  %v340_v15 = vadd.f32 %v309_v4, %v308_v3  ;;  %v314_v16 = vmul.f32 %v1910_v12, %v1910_v12  ;;  %v1929_v20 = vld [vmem:[%s1869_s6 + $0x48] sm:$0xff]  ;;  %v316_v23 = vmul.f32 %v1926_v19, %v1926_v19  ;;  %s1579_s15 = scalar_lea.vmem %s2154_s8, 2048  ;;  %p2220_p0 = scmp.ne.s32.totalorder %s2215_s30, 0 }
  0x6f   : > { %v315_v17 = vmul.f32 %v1913_v13, %v1913_v13  ;;  %v1923_v18 = vld [vmem:[%s1869_s6 + $0x58] sm:$0xff]  ;;  %v346_v21 = vadd.f32 %v313_v9, %v312_v6  ;;  %v317_v24 = vmul.f32 %v1929_v20, %v1929_v20  ;;  %v318_v26 = vmul.f32 %v1916_v14, %v1916_v14  ;;  %v1940_v28 = vld [vmem:[%s1869_s6 + $0x60] sm:$0xff]  ;;  %v1943_v29 = vld [vmem:[%s1869_s6 + $0x68] sm:$0xff]  ;;  %p1580_p11 = scmp.ne.s32.totalorder %s2154_s8, %s1579_s15  ;;  %s1660_s23 = smov [#allocation8]  }
  0x70   : > { %341 = vadd.xlane.f32.xlu0 %v340_v15  ;;  %v343_v22 = vadd.f32 %v311_v11, %v310_v10  ;;  %v319_v27 = vmul.f32 %v1923_v18, %v1923_v18  ;;  %v1946_v30 = vld [vmem:[%s1869_s6 + $0x70] sm:$0xff]  ;;  %v1949_v31 = vld [vmem:[%s1869_s6 + $0x78] sm:$0xff]  ;;  %v320_v33 = vmul.f32 %v1940_v28, %v1940_v28  ;;  %v321_v34 = vmul.f32 %v1943_v29, %v1943_v29  ;;  %v1966_v40 = vld [vmem:[%s1869_s6 + $0x80] sm:$0xff]  ;;  %s1583_s7 = sshll.u32 %s1660_s23, 4  ;;  %s1584_s7 = int_to_ptr.vmem [resolvable:$false] %s1583_s7 }
  0x71   : > { %347 = vadd.xlane.f32.xlu1 %v346_v21  ;;  %v349_v25 = vadd.f32 %v315_v17, %v314_v16  ;;  %v352_v32 = vadd.f32 %v317_v24, %v316_v23  ;;  %v1956_v35 = vld [vmem:[%s1869_s6 + $0x90] sm:$0xff]  ;;  %v1959_v36 = vld [vmem:[%s1869_s6 + $0x98] sm:$0xff]  ;;  %v322_v38 = vmul.f32 %v1946_v30, %v1946_v30  ;;  %v323_v39 = vmul.f32 %v1949_v31, %v1949_v31  ;;  %v1969_v41 = vld [vmem:[%s1869_s6 + $0x88] sm:$0xff]  ;;  %p1581_p1 = pnand %p1580_p11, %p2220_p0  ;;  %p1586_p5 = scmp.lt.s32.totalorder %s2154_s8, %s1584_s7 }
  0x72   : > { %v355_v37 = vadd.f32 %v319_v27, %v318_v26  ;;  %v1397_v42 = vld [vmem:[#allocation5 + $0x4] ss:$8 sps:$4 sm:$0xff]   ;;  %v1399_v43 = vld [vmem:[#allocation5] ss:$8 sps:$4 sm:$0xff]   ;;  %v1400_v44 = vld [vmem:[#allocation5 + $0x14] ss:$8 sps:$4 sm:$0xff]   ;;  %v358_v45 = vadd.f32 %v321_v34, %v320_v33  ;;  %v324_v46 = vmul.f32 %v1966_v40, %v1966_v40  ;;  %v325_v47 = vmul.f32 %v1969_v41, %v1969_v41 }
  0x73   : > { %v1976_v48 = vld [vmem:[%s1869_s6 + $0xb0] sm:$0xff]  ;;  %v1979_v49 = vld [vmem:[%s1869_s6 + $0xa0] sm:$0xff]  ;;  %672 = vmatprep.subr.bf16.mxu0 %v1397_v42  ;;  %v361_v50 = vadd.f32 %v323_v39, %v322_v38  ;;  %v326_v51 = vmul.f32 %v1956_v35, %v1956_v35  ;;  %v327_v52 = vmul.f32 %v1959_v36, %v1959_v36  ;;  %v1986_v53 = vld [vmem:[%s1869_s6 + $0xa8] sm:$0xff]  ;;  %p1582_p3 = pneg %p1581_p1 }
  0x74   : > { %344 = vadd.xlane.f32.xlu0 %v343_v22  ;;  %673 = vmatpush1.bf16.msra.mxu0 %v1399_v43  ;;  %v1402_v54 = vld [vmem:[#allocation5 + $0x10] ss:$8 sps:$4 sm:$0xff]   ;;  %v1403_v56 = vld [vmem:[#allocation5 + $0x24] ss:$8 sps:$4 sm:$0xff]   ;;  %v364_v57 = vadd.f32 %v325_v47, %v324_v46  ;;  %v328_v58 = vmul.f32 %v1979_v49, %v1979_v49  ;;  %v329_v59 = vmul.f32 %v1986_v53, %v1986_v53  ;;  %v1405_v6 = vld [vmem:[#allocation5 + $0x20] ss:$8 sps:$4 sm:$0xff]  }
  0x75   : > { %350 = vadd.xlane.f32.xlu1 %v349_v25  ;;  %v1989_v55 = vld [vmem:[%s1869_s6 + $0xb8] sm:$0xff]  ;;  %674 = vmatprep.subr.bf16.mxu0 %v1400_v44  ;;  %v1996_v60 = vld [vmem:[%s1869_s6 + $0xd0] sm:$0xff]  ;;  %v1999_v61 = vld [vmem:[%s1869_s6 + $0xc0] sm:$0xff]  ;;  %v367_v62 = vadd.f32 %v327_v52, %v326_v51  ;;  %v330_v63 = vmul.f32 %v1976_v48, %v1976_v48 }
  0x76   : > { %v331_v3 = vmul.f32 %v1989_v55, %v1989_v55  ;;  %v2006_v4 = vld [vmem:[%s1869_s6 + $0xc8] sm:$0xff]  ;;  %v2009_v9 = vld [vmem:[%s1869_s6 + $0xd8] sm:$0xff]  ;;  %v370_v11 = vadd.f32 %v329_v59, %v328_v58  ;;  %v332_v15 = vmul.f32 %v1999_v61, %v1999_v61  ;;  %v2016_v17 = vld [vmem:[%s1869_s6 + $0xf0] sm:$0xff]  ;;  %v334_v23 = vmul.f32 %v1996_v60, %v1996_v60 }
  0x77   : > { %v1406_v10 = vld [vmem:[#allocation5 + $0x34] ss:$8 sps:$4 sm:$0xff]   ;;  %v333_v16 = vmul.f32 %v2006_v4, %v2006_v4  ;;  %v2019_v21 = vld [vmem:[%s1869_s6 + $0xe0] sm:$0xff]  ;;  %v335_v24 = vmul.f32 %v2009_v9, %v2009_v9  ;;  %v2026_v25 = vld [vmem:[%s1869_s6 + $0xe8] sm:$0xff]  ;;  %v338_v39 = vmul.f32 %v2016_v17, %v2016_v17 }
  0x78   : > { %353 = vadd.xlane.f32.xlu0 %v352_v32  ;;  %675 = vmatpush1.bf16.msra.mxu0 %v1402_v54  ;;  %v373_v22 = vadd.f32 %v331_v3, %v330_v63  ;;  %v1408_v26 = vld [vmem:[#allocation5 + $0x30] ss:$8 sps:$4 sm:$0xff]   ;;  %v1409_v32 = vld [vmem:[#allocation5 + $0x44] ss:$8 sps:$4 sm:$0xff]   ;;  %v336_v34 = vmul.f32 %v2019_v21, %v2019_v21  ;;  %v1411_v43 = vld [vmem:[#allocation5 + $0x40] ss:$8 sps:$4 sm:$0xff]  }
  0x79   : > { %356 = vadd.xlane.f32.xlu1 %v355_v37  ;;  %676 = vmatprep.subr.bf16.mxu0 %v1403_v56  ;;  %v2029_v27 = vld [vmem:[%s1869_s6 + $0xf8] sm:$0xff]  ;;  %v376_v33 = vadd.f32 %v333_v16, %v332_v15  ;;  %v337_v37 = vmul.f32 %v2026_v25, %v2026_v25  ;;  %v379_v38 = vadd.f32 %v335_v24, %v334_v23  ;;  %v1417_v51 = vld [vmem:[#allocation5 + $0x60] ss:$8 sps:$4 sm:$0xff]   ;;  %v1421_v56 = vld [vmem:[#allocation5 + $0x84] ss:$8 sps:$4 sm:$0xff]   ;;  %s1585_s6 = scalar_lea.vmem %s1584_s7, 4096 }
  0x7a   : > { %v339_v42 = vmul.f32 %v2029_v27, %v2029_v27  ;;  %v1412_v44 = vld [vmem:[#allocation5 + $0x54] ss:$8 sps:$4 sm:$0xff]   ;;  %v1414_v47 = vld [vmem:[#allocation5 + $0x50] ss:$8 sps:$4 sm:$0xff]   ;;  %v1429_v63 = vld [vmem:[#allocation5 + $0xa0] ss:$8 sps:$4 sm:$0xff]   ;;  %p1587_p9 = scmp.lt.s32.totalorder %s1585_s6, %s1579_s15 }
  0x7b   : > { %v1418_v52 = vld [vmem:[#allocation5 + $0x74] ss:$8 sps:$4 sm:$0xff]   ;;  %v1420_v54 = vld [vmem:[#allocation5 + $0x70] ss:$8 sps:$4 sm:$0xff]   ;;  %v1441_v23 = vld [vmem:[#allocation5 + $0xe0] ss:$8 sps:$4 sm:$0xff]  }
  0x7c   : > { %359 = vadd.xlane.f32.xlu0 %v358_v45  ;;  %677 = vmatpush1.bf16.msra.mxu0 %v1405_v6  ;;  %v382_v45 = vadd.f32 %v337_v37, %v336_v34  ;;  %v385_v46 = vadd.f32 %v339_v42, %v338_v39  ;;  %v1424_v58 = vld [vmem:[#allocation5 + $0x94] ss:$8 sps:$4 sm:$0xff]   ;;  %v1426_v59 = vld [vmem:[#allocation5 + $0x90] ss:$8 sps:$4 sm:$0xff]   ;;  %v1447_v34 = vld [vmem:[#allocation7 + $0x48] sm:$0xff]   ;;  %p1588_p12 = por %p1587_p9, %p1586_p5 }
  0x7d   : > { %362 = vadd.xlane.f32.xlu1 %v361_v50  ;;  %678 = vmatprep.subr.bf16.mxu0 %v1406_v10  ;;  %v1415_v50 = vld [vmem:[#allocation5 + $0x64] ss:$8 sps:$4 sm:$0xff]   ;;  %v1430_v3 = vld [vmem:[#allocation5 + $0xb4] ss:$8 sps:$4 sm:$0xff]   ;;  %v1432_v6 = vld [vmem:[#allocation5 + $0xb0] ss:$8 sps:$4 sm:$0xff]  }
  0x7e   : > { %v1433_v10 = vld [vmem:[#allocation5 + $0xc4] ss:$8 sps:$4 sm:$0xff]   ;;  %v1436_v15 = vld [vmem:[#allocation5 + $0xd4] ss:$8 sps:$4 sm:$0xff]   ;;  %v1438_v16 = vld [vmem:[#allocation5 + $0xd0] ss:$8 sps:$4 sm:$0xff]   ;;  %p1589_p2 = pnand %p1588_p12, %p1582_p3 }
  0x7f   : > { %v1442_v24 = vld [vmem:[#allocation5 + $0xf4] ss:$8 sps:$4 sm:$0xff]   ;;  %v1448_v37 = vld [vmem:[#allocation7 + $0x8] sm:$0xff]  }
  0x80   : > { %365 = vadd.xlane.f32.xlu0 %v364_v57  ;;  %679 = vmatpush1.bf16.msra.mxu0 %v1408_v26  ;;  %v1423_v57 = vld [vmem:[#allocation5 + $0x80] ss:$8 sps:$4 sm:$0xff]   ;;  %v1444_v26 = vld [vmem:[#allocation5 + $0xf0] ss:$8 sps:$4 sm:$0xff]  }
  0x81   : > { %368 = vadd.xlane.f32.xlu1 %v367_v62  ;;  %680 = vmatprep.subr.bf16.mxu0 %v1409_v32  ;;  %v1427_v62 = vld [vmem:[#allocation5 + $0xa4] ss:$8 sps:$4 sm:$0xff]   ;;  %v1450_v39 = vld [vmem:[#allocation7 + $0x10] sm:$0xff]   ;;  %v1451_v42 = vld [vmem:[#allocation7 + $0x58] sm:$0xff]  }
  0x82   : > { %v1445_v32 = vld [vmem:[#allocation7 + $0x40] sm:$0xff]  }
  0x83   : > { %1258 = vmatprep.subr.bf16.mxu1 %v1445_v32 }
  0x84   : > { %371 = vadd.xlane.f32.xlu0 %v370_v11  ;;  %681 = vmatpush1.bf16.msra.mxu0 %v1411_v43  ;;  %v1435_v11 = vld [vmem:[#allocation5 + $0xc0] ss:$8 sps:$4 sm:$0xff]   ;;  %v1452_v43 = vld [vmem:[#allocation7 + $0x18] sm:$0xff]  }
  0x85   : > { %374 = vadd.xlane.f32.xlu1 %v373_v22  ;;  %682 = vmatprep.subr.bf16.mxu0 %v1412_v44  ;;  %v1439_v22 = vld [vmem:[#allocation5 + $0xe4] ss:$8 sps:$4 sm:$0xff]  }
  0x86   : > { %v1453_v44 = vld [vmem:[#allocation7 + $0x60] sm:$0xff]  }
  0x88   : > { %377 = vadd.xlane.f32.xlu0 %v376_v33  ;;  %683 = vmatpush1.bf16.msra.mxu0 %v1414_v47  ;;  %v1446_v33 = vld [vmem:[#allocation7] sm:$0xff]  }
  0x89   : > { %380 = vadd.xlane.f32.xlu1 %v379_v38  ;;  %684 = vmatprep.subr.bf16.mxu0 %v1415_v50  ;;  %v1449_v38 = vld [vmem:[#allocation7 + $0x50] sm:$0xff]  }
  0x8a   : > { %1259 = vmatpush3.bf16.msra.mxu1 %v1446_v33 }
  0x8b   : > { %1260 = vmatprep.subr.bf16.mxu1 %v1447_v34 }
  0x8c   : > { %383 = vadd.xlane.f32.xlu0 %v382_v45  ;;  %685 = vmatpush1.bf16.msra.mxu0 %v1417_v51  ;;  %v1454_v45 = vld [vmem:[#allocation7 + $0x20] sm:$0xff]  }
  0x8d   : > { %386 = vadd.xlane.f32.xlu1 %v385_v46  ;;  %686 = vmatprep.subr.bf16.mxu0 %v1418_v52  ;;  %v1455_v46 = vld [vmem:[#allocation7 + $0x68] sm:$0xff]  }
  0x8e   : > { %1261 = vmatpush3.bf16.msra.mxu1 %v1448_v37 }
  0x8f   : > { %1262 = vmatprep.subr.bf16.mxu1 %v1449_v38 }
  0x90   : > { %687 = vmatpush1.bf16.msra.mxu0 %v1420_v54 }
  0x91   : > { %688 = vmatprep.subr.bf16.mxu0 %v1421_v56 }
  0x92   : > { %1263 = vmatpush3.bf16.msra.mxu1 %v1450_v39 }
  0x93   : > { %1264 = vmatprep.subr.bf16.mxu1 %v1451_v42 }
  0x94   : > { %689 = vmatpush1.bf16.msra.mxu0 %v1423_v57 }
  0x95   : > { %690 = vmatprep.subr.bf16.mxu0 %v1424_v58 }
  0x96   : > { %1265 = vmatpush3.bf16.msra.mxu1 %v1452_v43 }
  0x97   : > { %1266 = vmatprep.subr.bf16.mxu1 %v1453_v44 }
  0x98   : > { %691 = vmatpush1.bf16.msra.mxu0 %v1426_v59 }
  0x99   : > { %692 = vmatprep.subr.bf16.mxu0 %v1427_v62 }
  0x9a   : > { %1267 = vmatpush3.bf16.msra.mxu1 %v1454_v45 }
  0x9b   : > { %1268 = vmatprep.subr.bf16.mxu1 %v1455_v46 }
  0x9c   : > { %693 = vmatpush1.bf16.msra.mxu0 %v1429_v63 }
  0x9d   : > { %694 = vmatprep.subr.bf16.mxu0 %v1430_v3 }
  0xa0   : > { %695 = vmatpush1.bf16.msra.mxu0 %v1432_v6 }
  0xa1   : > { %696 = vmatprep.subr.bf16.mxu0 %v1433_v10 }
  0xa4   : > { %697 = vmatpush1.bf16.msra.mxu0 %v1435_v11 }
  0xa5   : > { %698 = vmatprep.subr.bf16.mxu0 %v1436_v15 }
  0xa8   : > { %699 = vmatpush1.bf16.msra.mxu0 %v1438_v16 }
  0xa9   : > { %700 = vmatprep.subr.bf16.mxu0 %v1439_v22 }
  0xac   : > { %701 = vmatpush1.bf16.msra.mxu0 %v1441_v23 }
  0xad   : > { %702 = vmatprep.subr.bf16.mxu0 %v1442_v24 }
  0xb0   : > { %703 = vmatpush1.bf16.msra.mxu0 %v1444_v26 }
  0xfd   : > { %v342_v47 = vpop.xlane.xlu0 %341 }
  0xfe   : > { %v388_v50 = vmax.f32 %v342_v47, 1e-24  ;;  %v348_v51 = vpop.xlane.xlu1 %347 }
  0xff   : > { %v390_v52 = vmax.f32 %v348_v51, 1e-24 }
 0x100   : > { %1461 = vrsqrt.f32 %v388_v50 }
 0x101   : > { %1463 = vrsqrt.f32 %v390_v52  ;;  %v345_v54 = vpop.xlane.xlu0 %344 }
 0x102   : > { %v389_v56 = vmax.f32 %v345_v54, 1e-24  ;;  %v351_v57 = vpop.xlane.xlu1 %350 }
 0x103   : > { %v391_v58 = vmax.f32 %v351_v57, 1e-24 }
 0x104   : > { %1465 = vrsqrt.f32 %v389_v56 }
 0x105   : > { %1467 = vrsqrt.f32 %v391_v58  ;;  %v354_v59 = vpop.xlane.xlu0 %353 }
 0x106   : > { %v357_v62 = vpop.xlane.xlu1 %356  ;;  %v392_v63 = vmax.f32 %v354_v59, 1e-24 }
 0x107   : > { %v393_v3 = vmax.f32 %v357_v62, 1e-24 }
 0x108   : > { %1469 = vrsqrt.f32 %v392_v63 }
 0x109   : > { %1471 = vrsqrt.f32 %v393_v3  ;;  %v360_v6 = vpop.xlane.xlu0 %359 }
 0x10a   : > { %v1462_v10 = vpop.eup %1461  ;;  %v363_v11 = vpop.xlane.xlu1 %362  ;;  %v394_v16 = vmax.f32 %v360_v6, 1e-24 }
 0x10b   : > { %v1464_v15 = vpop.eup %1463  ;;  %v395_v22 = vmax.f32 %v363_v11, 1e-24  ;;  %v421_v24 = vmul.f32 %v1462_v10, %v1883_v1  ;;  %v420_v34 = vmul.f32 %v1462_v10, %v1880_v0 }
 0x10c   : > { %v425_v26 = vmul.f32 %v1464_v15, %v1893_v5  ;;  %1473 = vrsqrt.f32 %v394_v16 }
 0x10d   : > { %1475 = vrsqrt.f32 %v395_v22  ;;  %v366_v39 = vpop.xlane.xlu0 %365 }
 0x10e   : > { %v1466_v23 = vpop.eup %1465  ;;  %v369_v44 = vpop.xlane.xlu1 %368  ;;  %v396_v5 = vmax.f32 %v366_v39, 1e-24 }
 0x10f   : > { %v1468_v32 = vpop.eup %1467  ;;  %v423_v33 = vmul.f32 %v1466_v23, %v1901_v8  ;;  %v422_v37 = vmul.f32 %v1466_v23, %v1898_v7  ;;  %v397_v47 = vmax.f32 %v369_v44, 1e-24  ;;  %v424_v8 = vmul.f32 %v1464_v15, %v1886_v2 }
 0x110   : > { %v427_v38 = vmul.f32 %v1468_v32, %v1913_v13  ;;  %v426_v13 = vmul.f32 %v1468_v32, %v1910_v12  ;;  %1477 = vrsqrt.f32 %v396_v5 }
 0x111   : > { %v453_v42 = vpack.c.bf16 %v423_v33, %v421_v24  ;;  %v452_v43 = vpack.c.bf16 %v422_v37, %v420_v34  ;;  %1479 = vrsqrt.f32 %v397_v47  ;;  %v372_v50 = vpop.xlane.xlu0 %371 }
 0x112   : > { %v1470_v45 = vpop.eup %1469  ;;  %v455_v46 = vpack.c.bf16 %v427_v38, %v425_v26  ;;  %v375_v54 = vpop.xlane.xlu1 %374  ;;  %v454_v57 = vpack.c.bf16 %v426_v13, %v424_v8  ;;  %v398_v58 = vmax.f32 %v372_v50, 1e-24  ;;  %v1456_v13 = vld [vmem:[#allocation7 + $0x28] sm:$0xff]   ;;  %v1458_v50 = vld [vmem:[#allocation7 + $0x30] sm:$0xff]  }
 0x113   : > { %v1472_v1 = vpop.eup %1471  ;;  %704 = vmatprep.mubr.bf16.mxu0 %v453_v42  ;;  %v429_v0 = vmul.f32 %v1470_v45, %v1929_v20  ;;  %v428_v59 = vmul.f32 %v1470_v45, %v1926_v19  ;;  %v399_v62 = vmax.f32 %v375_v54, 1e-24  ;;  %1269 = vmatpush3.bf16.msra.mxu1 %v1456_v13 }
 0x114   : > { %705 = vmatmul.mubr.bf16.vlgmr.msra.gmra.mrb[0].mxu0 %v452_v43  ;;  %v431_v7 = vmul.f32 %v1472_v1, %v1923_v18  ;;  %v430_v20 = vmul.f32 %v1472_v1, %v1916_v14  ;;  %1481 = vrsqrt.f32 %v398_v58 }
 0x115   : > { %714 = vmatprep.mubr.bf16.mxu0 %v455_v46  ;;  %1483 = vrsqrt.f32 %v399_v62  ;;  %v378_v63 = vpop.xlane.xlu0 %377 }
 0x116   : > { %v1474_v51 = vpop.eup %1473  ;;  %v457_v52 = vpack.c.bf16 %v431_v7, %v429_v0  ;;  %v456_v18 = vpack.c.bf16 %v430_v20, %v428_v59  ;;  %v381_v10 = vpop.xlane.xlu1 %380  ;;  %v400_v15 = vmax.f32 %v378_v63, 1e-24 }
 0x117   : > { %v1476_v56 = vpop.eup %1475  ;;  %v433_v2 = vmul.f32 %v1474_v51, %v1943_v29  ;;  %v432_v19 = vmul.f32 %v1474_v51, %v1940_v28  ;;  %v401_v16 = vmax.f32 %v381_v10, 1e-24 }
 0x118   : > { %v435_v12 = vmul.f32 %v1476_v56, %v1949_v31  ;;  %v434_v14 = vmul.f32 %v1476_v56, %v1946_v30  ;;  %1485 = vrsqrt.f32 %v400_v15 }
 0x119   : > { %1487 = vrsqrt.f32 %v401_v16  ;;  %v384_v23 = vpop.xlane.xlu0 %383 }
 0x11a   : > { %v1478_v3 = vpop.eup %1477  ;;  %v459_v6 = vpack.c.bf16 %v435_v12, %v433_v2  ;;  %v458_v22 = vpack.c.bf16 %v434_v14, %v432_v19  ;;  %v387_v32 = vpop.xlane.xlu1 %386  ;;  %v402_v34 = vmax.f32 %v384_v23, 1e-24 }
 0x11b   : > { %v1480_v11 = vpop.eup %1479  ;;  %v437_v29 = vmul.f32 %v1478_v3, %v1969_v41  ;;  %v436_v28 = vmul.f32 %v1478_v3, %v1966_v40  ;;  %v403_v37 = vmax.f32 %v387_v32, 1e-24 }
 0x11c   : > { %715 = vmatmul.mubr.bf16.gmra.mrb[4].mxu0 %v454_v57  ;;  %v439_v31 = vmul.f32 %v1480_v11, %v1959_v36  ;;  %v438_v30 = vmul.f32 %v1480_v11, %v1956_v35  ;;  %1489 = vrsqrt.f32 %v402_v34 }
 0x11d   : > { %724 = vmatprep.mubr.bf16.mxu0 %v457_v52  ;;  %1491 = vrsqrt.f32 %v403_v37 }
 0x11e   : > { %v1482_v24 = vpop.eup %1481  ;;  %v461_v26 = vpack.c.bf16 %v439_v31, %v437_v29  ;;  %v460_v38 = vpack.c.bf16 %v438_v30, %v436_v28 }
 0x11f   : > { %v1484_v33 = vpop.eup %1483  ;;  %v441_v41 = vmul.f32 %v1482_v24, %v1986_v53  ;;  %v440_v44 = vmul.f32 %v1482_v24, %v1979_v49 }
 0x120   : > { %v443_v36 = vmul.f32 %v1484_v33, %v1989_v55  ;;  %v442_v45 = vmul.f32 %v1484_v33, %v1976_v48 }
 0x122   : > { %v1486_v39 = vpop.eup %1485  ;;  %v463_v42 = vpack.c.bf16 %v443_v36, %v441_v41  ;;  %v462_v46 = vpack.c.bf16 %v442_v45, %v440_v44 }
 0x123   : > { %v1488_v43 = vpop.eup %1487  ;;  %v445_v35 = vmul.f32 %v1486_v39, %v2006_v4  ;;  %v444_v5 = vmul.f32 %v1486_v39, %v1999_v61  ;;  %v1457_v61 = vld [vmem:[#allocation7 + $0x70] sm:$0xff]  }
 0x124   : > { %725 = vmatmul.mubr.bf16.gmra.mrb[8].mxu0 %v456_v18  ;;  %v447_v40 = vmul.f32 %v1488_v43, %v2009_v9  ;;  %v446_v47 = vmul.f32 %v1488_v43, %v1996_v60  ;;  %1270 = vmatprep.subr.bf16.mxu1 %v1457_v61  ;;  %v1459_v60 = vld [vmem:[#allocation7 + $0x78] sm:$0xff]  }
 0x125   : > { %734 = vmatprep.mubr.bf16.mxu0 %v459_v6  ;;  %1271 = vmatpush3.bf16.msra.mxu1 %v1458_v50 }
 0x126   : > { %v1490_v53 = vpop.eup %1489  ;;  %v465_v1 = vpack.c.bf16 %v447_v40, %v445_v35  ;;  %v464_v48 = vpack.c.bf16 %v446_v47, %v444_v5  ;;  %1272 = vmatprep.subr.bf16.mxu1 %v1459_v60 }
 0x127   : > { %v1492_v55 = vpop.eup %1491  ;;  %v449_v0 = vmul.f32 %v1490_v53, %v2026_v25  ;;  %v448_v4 = vmul.f32 %v1490_v53, %v2019_v21  ;;  %v1460_v25 = vld [vmem:[#allocation7 + $0x38] sm:$0xff]  }
 0x128   : > { %v451_v49 = vmul.f32 %v1492_v55, %v2029_v27  ;;  %v450_v9 = vmul.f32 %v1492_v55, %v2016_v17  ;;  %v502_v27 = vlaneseq  ;;  %v500_v17 = vld [vmem:[%s2203_s2] sm:$0x3] }
 0x129   : > { %1273 = vmatpush3.bf16.msra.mxu1 %v1460_v25 }
 0x12a   : > { %v467_v7 = vpack.c.bf16 %v451_v49, %v449_v0  ;;  %v466_v8 = vpack.c.bf16 %v450_v9, %v448_v4  ;;  %v503_v51 = vshrl.u32 %v502_v27, 7 }
 0x12c   : > { %735 = vmatmul.mubr.bf16.gmra.mrb[12].mxu0 %v458_v22  ;;  %v504_v52 = vsub.s32 0, %v503_v51  ;;  %v508_v21 = vsub.s32 1, %v503_v51 }
 0x12d   : > { %744 = vmatprep.mubr.bf16.mxu0 %v461_v26 }
 0x12e   : > { %v2074_v54 = vrot.slane %v500_v17, %v504_v52  ;;  %v2076_v56 = vrot.slane %v500_v17, %v508_v21 }
 0x134   : > { %745 = vmatmul.mubr.bf16.gmra.mrb[16].mxu0 %v460_v38 }
 0x135   : > { %754 = vmatprep.mubr.bf16.mxu0 %v463_v42 }
 0x13c   : > { %755 = vmatmul.mubr.bf16.gmra.mrb[20].mxu0 %v462_v46 }
 0x13d   : > { %764 = vmatprep.mubr.bf16.mxu0 %v465_v1 }
 0x144   : > { %765 = vmatmul.mubr.bf16.gmra.mrb[24].mxu0 %v464_v48 }
 0x145   : > { %774 = vmatprep.mubr.bf16.mxu0 %v467_v7 }
 0x14c   : > { %775 = vmatmul.mubr.bf16.gmra.mrb[28].mxu0 %v466_v8 }
 0x1e7   : > { %v706_v57 = vpop.f32.mrb[0].mxu0 }
 0x1e8   : > { %v707_v58 = vadd.f32 %v706_v57, %v2074_v54  ;;  %v708_v59 = vpop.f32.mrb[1].mxu0 }
 0x1e9   : > { %v709_v20 = vadd.f32 %v708_v59, %v2076_v56  ;;  %v710_v62 = vpop.f32.mrb[2].mxu0 }
 0x1ea   : > { %v711_v2 = vadd.f32 %v710_v62, %v2074_v54  ;;  %v712_v12 = vpop.f32.mrb[3].mxu0  ;;  %v785_v63 = vmax.f32 %v707_v58, 0.0 }
 0x1eb   : > { %v713_v18 = vadd.f32 %v712_v12, %v2076_v56  ;;  %v786_v6 = vmax.f32 %v709_v20, 0.0 }
 0x1ec   : > { %v787_v3 = vmax.f32 %v711_v2, 0.0 }
 0x1ed   : > { %v788_v10 = vmax.f32 %v713_v18, 0.0 }
 0x1ee   : > { %v817_v11 = vpack.c.bf16 %v787_v3, %v785_v63 }
 0x1ef   : > { %v716_v15 = vpop.f32.mrb[4].mxu0  ;;  %v818_v19 = vpack.c.bf16 %v788_v10, %v786_v6 }
 0x1f0   : > { %v717_v14 = vadd.f32 %v716_v15, %v2074_v54  ;;  %v718_v16 = vpop.f32.mrb[5].mxu0 }
 0x1f1   : > { %v719_v29 = vadd.f32 %v718_v16, %v2076_v56  ;;  %v720_v31 = vpop.f32.mrb[6].mxu0  ;;  %1000 = vmatprep.mubr.bf16.mxu1 %v818_v19 }
 0x1f2   : > { %v721_v22 = vadd.f32 %v720_v31, %v2074_v54  ;;  %v722_v23 = vpop.f32.mrb[7].mxu0  ;;  %1001 = vmatmul.mubr.bf16.vlgmr.msra.gmra.mrb[0].mxu1 %v817_v11  ;;  %v789_v26 = vmax.f32 %v717_v14, 0.0 }
 0x1f3   : > { %v723_v24 = vadd.f32 %v722_v23, %v2076_v56  ;;  %v790_v33 = vmax.f32 %v719_v29, 0.0 }
 0x1f4   : > { %v791_v32 = vmax.f32 %v721_v22, 0.0 }
 0x1f5   : > { %v792_v34 = vmax.f32 %v723_v24, 0.0 }
 0x1f6   : > { %v819_v28 = vpack.c.bf16 %v791_v32, %v789_v26 }
 0x1f7   : > { %v820_v30 = vpack.c.bf16 %v792_v34, %v790_v33  ;;  %v726_v37 = vpop.f32.mrb[8].mxu0 }
 0x1f8   : > { %v727_v41 = vadd.f32 %v726_v37, %v2074_v54  ;;  %v728_v36 = vpop.f32.mrb[9].mxu0 }
 0x1f9   : > { %v729_v38 = vadd.f32 %v728_v36, %v2076_v56  ;;  %v730_v39 = vpop.f32.mrb[10].mxu0  ;;  %1008 = vmatprep.mubr.bf16.mxu1 %v820_v30 }
 0x1fa   : > { %v731_v42 = vadd.f32 %v730_v39, %v2074_v54  ;;  %v732_v43 = vpop.f32.mrb[11].mxu0  ;;  %1009 = vmatmul.mubr.bf16.gmra.mrb[4].mxu1 %v819_v28  ;;  %v793_v45 = vmax.f32 %v727_v41, 0.0 }
 0x1fb   : > { %v733_v44 = vadd.f32 %v732_v43, %v2076_v56  ;;  %v794_v40 = vmax.f32 %v729_v38, 0.0 }
 0x1fc   : > { %v795_v35 = vmax.f32 %v731_v42, 0.0 }
 0x1fd   : > { %v796_v46 = vmax.f32 %v733_v44, 0.0 }
 0x1fe   : > { %v821_v53 = vpack.c.bf16 %v795_v35, %v793_v45 }
 0x1ff   : > { %v822_v1 = vpack.c.bf16 %v796_v46, %v794_v40  ;;  %v736_v55 = vpop.f32.mrb[12].mxu0 }
 0x200   : > { %v737_v5 = vadd.f32 %v736_v55, %v2074_v54  ;;  %v738_v47 = vpop.f32.mrb[13].mxu0 }
 0x201   : > { %v739_v0 = vadd.f32 %v738_v47, %v2076_v56  ;;  %v740_v49 = vpop.f32.mrb[14].mxu0  ;;  %1016 = vmatprep.mubr.bf16.mxu1 %v822_v1 }
 0x202   : > { %v741_v48 = vadd.f32 %v740_v49, %v2074_v54  ;;  %v742_v7 = vpop.f32.mrb[15].mxu0  ;;  %1017 = vmatmul.mubr.bf16.gmra.mrb[8].mxu1 %v821_v53  ;;  %v797_v9 = vmax.f32 %v737_v5, 0.0 }
 0x203   : > { %v743_v4 = vadd.f32 %v742_v7, %v2076_v56  ;;  %v798_v13 = vmax.f32 %v739_v0, 0.0 }
 0x204   : > { %v799_v8 = vmax.f32 %v741_v48, 0.0 }
 0x205   : > { %v800_v61 = vmax.f32 %v743_v4, 0.0 }
 0x206   : > { %v823_v50 = vpack.c.bf16 %v799_v8, %v797_v9  ;;  %v2114_v8 = vld [vmem:[%s2205_s4] ss:$0 sm:$0xff] }
 0x207   : > { %v824_v60 = vpack.c.bf16 %v800_v61, %v798_v13  ;;  %v746_v25 = vpop.f32.mrb[16].mxu0 }
 0x208   : > { %v747_v27 = vadd.f32 %v746_v25, %v2074_v54  ;;  %v748_v51 = vpop.f32.mrb[17].mxu0 }
 0x209   : > { %v749_v52 = vadd.f32 %v748_v51, %v2076_v56  ;;  %v750_v17 = vpop.f32.mrb[18].mxu0  ;;  %1024 = vmatprep.mubr.bf16.mxu1 %v824_v60 }
 0x20a   : > { %v751_v21 = vadd.f32 %v750_v17, %v2074_v54  ;;  %v752_v57 = vpop.f32.mrb[19].mxu0  ;;  %1025 = vmatmul.mubr.bf16.gmra.mrb[12].mxu1 %v823_v50  ;;  %v801_v59 = vmax.f32 %v747_v27, 0.0 }
 0x20b   : > { %v753_v58 = vadd.f32 %v752_v57, %v2076_v56  ;;  %v802_v62 = vmax.f32 %v749_v52, 0.0 }
 0x20c   : > { %v803_v20 = vmax.f32 %v751_v21, 0.0 }
 0x20d   : > { %v804_v2 = vmax.f32 %v753_v58, 0.0 }
 0x20e   : > { %v825_v12 = vpack.c.bf16 %v803_v20, %v801_v59 }
 0x20f   : > { %v826_v18 = vpack.c.bf16 %v804_v2, %v802_v62  ;;  %v756_v63 = vpop.f32.mrb[20].mxu0 }
 0x210   : > { %v757_v3 = vadd.f32 %v756_v63, %v2074_v54  ;;  %v758_v6 = vpop.f32.mrb[21].mxu0 }
 0x211   : > { %v759_v10 = vadd.f32 %v758_v6, %v2076_v56  ;;  %v760_v11 = vpop.f32.mrb[22].mxu0  ;;  %1032 = vmatprep.mubr.bf16.mxu1 %v826_v18 }
 0x212   : > { %v761_v15 = vadd.f32 %v760_v11, %v2074_v54  ;;  %v762_v19 = vpop.f32.mrb[23].mxu0  ;;  %1033 = vmatmul.mubr.bf16.gmra.mrb[16].mxu1 %v825_v12  ;;  %v805_v16 = vmax.f32 %v757_v3, 0.0 }
 0x213   : > { %v763_v14 = vadd.f32 %v762_v19, %v2076_v56  ;;  %v806_v31 = vmax.f32 %v759_v10, 0.0 }
 0x214   : > { %v807_v29 = vmax.f32 %v761_v15, 0.0 }
 0x215   : > { %v808_v22 = vmax.f32 %v763_v14, 0.0 }
 0x216   : > { %v827_v23 = vpack.c.bf16 %v807_v29, %v805_v16 }
 0x217   : > { %v828_v24 = vpack.c.bf16 %v808_v22, %v806_v31  ;;  %v766_v26 = vpop.f32.mrb[24].mxu0 }
 0x218   : > { %v767_v32 = vadd.f32 %v766_v26, %v2074_v54  ;;  %v768_v33 = vpop.f32.mrb[25].mxu0 }
 0x219   : > { %v769_v34 = vadd.f32 %v768_v33, %v2076_v56  ;;  %v770_v28 = vpop.f32.mrb[26].mxu0  ;;  %1040 = vmatprep.mubr.bf16.mxu1 %v828_v24 }
 0x21a   : > { %v771_v30 = vadd.f32 %v770_v28, %v2074_v54  ;;  %v772_v37 = vpop.f32.mrb[27].mxu0  ;;  %1041 = vmatmul.mubr.bf16.gmra.mrb[20].mxu1 %v827_v23  ;;  %v809_v36 = vmax.f32 %v767_v32, 0.0 }
 0x21b   : > { %v773_v41 = vadd.f32 %v772_v37, %v2076_v56  ;;  %v810_v39 = vmax.f32 %v769_v34, 0.0 }
 0x21c   : > { %v811_v38 = vmax.f32 %v771_v30, 0.0 }
 0x21d   : > { %v812_v42 = vmax.f32 %v773_v41, 0.0 }
 0x21e   : > { %v829_v43 = vpack.c.bf16 %v811_v38, %v809_v36 }
 0x21f   : > { %v830_v44 = vpack.c.bf16 %v812_v42, %v810_v39  ;;  %v776_v45 = vpop.f32.mrb[28].mxu0 }
 0x220   : > { %v777_v35 = vadd.f32 %v776_v45, %v2074_v54  ;;  %v778_v40 = vpop.f32.mrb[29].mxu0 }
 0x221   : > { %v779_v46 = vadd.f32 %v778_v40, %v2076_v56  ;;  %v780_v53 = vpop.f32.mrb[30].mxu0  ;;  %1048 = vmatprep.mubr.bf16.mxu1 %v830_v44 }
 0x222   : > { %v781_v1 = vadd.f32 %v780_v53, %v2074_v54  ;;  %v782_v55 = vpop.f32.mrb[31].mxu0  ;;  %1049 = vmatmul.mubr.bf16.gmra.mrb[24].mxu1 %v829_v43  ;;  %v813_v47 = vmax.f32 %v777_v35, 0.0 }
 0x223   : > { %v783_v5 = vadd.f32 %v782_v55, %v2076_v56  ;;  %v814_v49 = vmax.f32 %v779_v46, 0.0 }
 0x224   : > { %v815_v0 = vmax.f32 %v781_v1, 0.0 }
 0x225   : > { %v816_v48 = vmax.f32 %v783_v5, 0.0 }
 0x226   : > { %v831_v7 = vpack.c.bf16 %v815_v0, %v813_v47 }
 0x227   : > { %v832_v4 = vpack.c.bf16 %v816_v48, %v814_v49 }
 0x229   : > { %1056 = vmatprep.mubr.bf16.mxu1 %v832_v4 }
 0x22a   : > { %1057 = vmatmul.mubr.bf16.gmra.mrb[28].mxu1 %v831_v7 }
 0x2c5   : > { %v1274_v9 = vpop.f32.mrb[0].mxu1 }
 0x2c6   : > { %v1275_v54 = vpop.f32.mrb[1].mxu1 }
 0x2c7   : > { %v1276_v13 = vadd.f32 %v1275_v54, %v1274_v9  ;;  %v1277_v61 = vpop.f32.mrb[2].mxu1 }
 0x2c8   : > { %v1278_v50 = vpop.f32.mrb[3].mxu1 }
 0x2c9   : > { %v1003_v56 = vadd.f32 %v1276_v13, %v2114_v8  ;;  %v1279_v60 = vadd.f32 %v1278_v50, %v1277_v61 }
 0x2cb   : > { %1065 = vst [vmem:[%s2117_s13] sm:$0xff] %v1003_v56  ;;  %v1006_v25 = vadd.f32 %v1279_v60, %v2114_v8 }
 0x2cd   : > { %1066 = vst [vmem:[%s2117_s13 + $0x8] sm:$0xff] %v1006_v25  ;;  %v1280_v27 = vpop.f32.mrb[4].mxu1 }
 0x2ce   : > { %v1281_v51 = vpop.f32.mrb[5].mxu1 }
 0x2cf   : > { %v1282_v52 = vadd.f32 %v1281_v51, %v1280_v27  ;;  %v1283_v17 = vpop.f32.mrb[6].mxu1 }
 0x2d0   : > { %v1284_v21 = vpop.f32.mrb[7].mxu1 }
 0x2d1   : > { %v1011_v57 = vadd.f32 %v1282_v52, %v2114_v8  ;;  %v1285_v58 = vadd.f32 %v1284_v21, %v1283_v17 }
 0x2d3   : > { %1067 = vst [vmem:[%s2117_s13 + $0x10] sm:$0xff] %v1011_v57  ;;  %v1014_v59 = vadd.f32 %v1285_v58, %v2114_v8 }
 0x2d5   : > { %1068 = vst [vmem:[%s2117_s13 + $0x18] sm:$0xff] %v1014_v59  ;;  %v1286_v20 = vpop.f32.mrb[8].mxu1 }
 0x2d6   : > { %v1287_v62 = vpop.f32.mrb[9].mxu1 }
 0x2d7   : > { %v1288_v2 = vadd.f32 %v1287_v62, %v1286_v20  ;;  %v1289_v12 = vpop.f32.mrb[10].mxu1 }
 0x2d8   : > { %v1290_v18 = vpop.f32.mrb[11].mxu1 }
 0x2d9   : > { %v1019_v63 = vadd.f32 %v1288_v2, %v2114_v8  ;;  %v1291_v3 = vadd.f32 %v1290_v18, %v1289_v12 }
 0x2db   : > { %1069 = vst [vmem:[%s2117_s13 + $0x20] sm:$0xff] %v1019_v63  ;;  %v1022_v6 = vadd.f32 %v1291_v3, %v2114_v8 }
 0x2dd   : > { %1070 = vst [vmem:[%s2117_s13 + $0x28] sm:$0xff] %v1022_v6  ;;  %v1292_v10 = vpop.f32.mrb[12].mxu1 }
 0x2de   : > { %v1293_v11 = vpop.f32.mrb[13].mxu1 }
 0x2df   : > { %v1294_v15 = vadd.f32 %v1293_v11, %v1292_v10  ;;  %v1295_v19 = vpop.f32.mrb[14].mxu1 }
 0x2e0   : > { %v1296_v14 = vpop.f32.mrb[15].mxu1 }
 0x2e1   : > { %v1027_v16 = vadd.f32 %v1294_v15, %v2114_v8  ;;  %v1297_v29 = vadd.f32 %v1296_v14, %v1295_v19 }
 0x2e3   : > { %1071 = vst [vmem:[%s2117_s13 + $0x30] sm:$0xff] %v1027_v16  ;;  %v1030_v31 = vadd.f32 %v1297_v29, %v2114_v8 }
 0x2e5   : > { %1072 = vst [vmem:[%s2117_s13 + $0x38] sm:$0xff] %v1030_v31  ;;  %v1298_v22 = vpop.f32.mrb[16].mxu1 }
 0x2e6   : > { %v1299_v23 = vpop.f32.mrb[17].mxu1 }
 0x2e7   : > { %v1300_v24 = vadd.f32 %v1299_v23, %v1298_v22  ;;  %v1301_v26 = vpop.f32.mrb[18].mxu1 }
 0x2e8   : > { %v1302_v32 = vpop.f32.mrb[19].mxu1 }
 0x2e9   : > { %v1035_v33 = vadd.f32 %v1300_v24, %v2114_v8  ;;  %v1303_v34 = vadd.f32 %v1302_v32, %v1301_v26 }
 0x2eb   : > { %1073 = vst [vmem:[%s2117_s13 + $0x40] sm:$0xff] %v1035_v33  ;;  %v1038_v28 = vadd.f32 %v1303_v34, %v2114_v8 }
 0x2ed   : > { %1074 = vst [vmem:[%s2117_s13 + $0x48] sm:$0xff] %v1038_v28  ;;  %v1304_v30 = vpop.f32.mrb[20].mxu1 }
 0x2ee   : > { %v1305_v37 = vpop.f32.mrb[21].mxu1 }
 0x2ef   : > { %v1306_v41 = vadd.f32 %v1305_v37, %v1304_v30  ;;  %v1307_v36 = vpop.f32.mrb[22].mxu1 }
 0x2f0   : > { %v1308_v38 = vpop.f32.mrb[23].mxu1 }
 0x2f1   : > { %v1043_v39 = vadd.f32 %v1306_v41, %v2114_v8  ;;  %v1309_v42 = vadd.f32 %v1308_v38, %v1307_v36 }
 0x2f3   : > { %1075 = vst [vmem:[%s2117_s13 + $0x50] sm:$0xff] %v1043_v39  ;;  %v1046_v43 = vadd.f32 %v1309_v42, %v2114_v8 }
 0x2f5   : > { %1076 = vst [vmem:[%s2117_s13 + $0x58] sm:$0xff] %v1046_v43  ;;  %v1310_v44 = vpop.f32.mrb[24].mxu1 }
 0x2f6   : > { %v1311_v45 = vpop.f32.mrb[25].mxu1 }
 0x2f7   : > { %v1312_v35 = vadd.f32 %v1311_v45, %v1310_v44  ;;  %v1313_v40 = vpop.f32.mrb[26].mxu1 }
 0x2f8   : > { %v1314_v46 = vpop.f32.mrb[27].mxu1 }
 0x2f9   : > { %v1051_v53 = vadd.f32 %v1312_v35, %v2114_v8  ;;  %v1315_v1 = vadd.f32 %v1314_v46, %v1313_v40 }
 0x2fb   : > { %1077 = vst [vmem:[%s2117_s13 + $0x60] sm:$0xff] %v1051_v53  ;;  %v1054_v55 = vadd.f32 %v1315_v1, %v2114_v8 }
 0x2fd   : > { %1078 = vst [vmem:[%s2117_s13 + $0x68] sm:$0xff] %v1054_v55  ;;  %v1316_v5 = vpop.f32.mrb[28].mxu1 }
 0x2fe   : > { %v1317_v47 = vpop.f32.mrb[29].mxu1 }
 0x2ff   : > { %v1318_v0 = vadd.f32 %v1317_v47, %v1316_v5  ;;  %v1319_v49 = vpop.f32.mrb[30].mxu1 }
 0x300   : > { %v1320_v48 = vpop.f32.mrb[31].mxu1 }
 0x301   : > { %v1059_v7 = vadd.f32 %v1318_v0, %v2114_v8  ;;  %v1321_v4 = vadd.f32 %v1320_v48, %v1319_v49 }
 0x303   : > { %1079 = vst [vmem:[%s2117_s13 + $0x70] sm:$0xff] %v1059_v7  ;;  %v1062_v9 = vadd.f32 %v1321_v4, %v2114_v8 }
 0x305   : > { %1080 = vst [vmem:[%s2117_s13 + $0x78] sm:$0xff] %v1062_v9 }
 0x306   : > { %1592 = shalt.err (!%p1589_p2)
}
 0x307   : > { %s1593_s24 = scalar_lea.hbm %s2152_s14, 2048  ;;  %s1597_s28 = scalar_lea.hbm %s2206_s5, 4096 }
 0x308   : > { %p1594_p13 = scmp.ne.s32.totalorder %s2152_s14, %s1593_s24  ;;  %p1598_p4 = scmp.lt.u32.totalorder %s2152_s14, %s2206_s5 }
 0x309   : > { %p1599_p7 = scmp.lt.u32.totalorder %s1597_s28, %s1593_s24  ;;  %p1601_p11 = scmp.lt.u32.totalorder %s1593_s24, %s2152_s14 }
 0x30a   : > { %p1595_p6 = pnand %p1594_p13, %p2220_p0 }
 0x30b   : > { %p1600_p8 = por %p1599_p7, %p1598_p4 }
 0x30c   : > { %p1596_p10 = pneg %p1595_p6 }
 0x30d   : > { %p1602_p1 = por %p1601_p11, %p1600_p8 }
 0x30f   : > { %p1603_p3 = pnand %p1602_p1, %p1596_p10 }
 0x311   : > { %1606 = shalt.err (!%p1603_p3)
}
 0x312   : > { %s1661_s29 = smov 128   ;;  %s1662_s9 = smov 8  }
 0x313   : > { %1332 = dma.vmem_to_hbm [thread:$0]  (%p2220_p0), %s2154_s8, 2048, %s2152_s14, %s1082_s22, %s1661_s29, %s1661_s29, %s1662_s9  }
 0x314 PF: > { %s1110_s11 = sand.u32 1, %s1637_s18   ;;  %p2221_p5 = scmp.ne.s32.totalorder %s2211_s25, 0 }
 0x315   : > { %p2222_p9 = scmp.ge.s32.totalorder %s1649_s21, 2  ;;  %s1111_s15 = scalar_lea.sflag [#allocation4], %s1110_s11 }
 0x317   : > { %p1346_p12 = pnand %p2222_p9, %p2221_p5 }
 0x319   : > { %1632 = dma.done.wait (!%p1346_p12), %s1111_s15, 2048  }
 0x31a   : > { %1634 = vsyncadd (!%p1346_p12), %s1111_s15, 4294965248  ;;  %p19_p2 = scmp.ge.s32.totalorder %s1803_s16, 4   ;;  %s2223_s18 = smov %s1641_s19 }
 0x31b   : > { %s2224_s19 = smov %s1645_s20  ;;  %s2225_s20 = smov %s1812_s27 }
 0x31c   : > { %s2226_s21 = smov %s1803_s16  ;;  %21 = sbr.rel (!%p19_p2) target bundleno = 6 (0x6), region = 93 }
 0x323   :  { %1116 = vsyncpa [#allocation3], 1 }
 0x324   :  { %1118 = vsyncpa [#allocation3 + $0x1], 1 }
 0x325   :  { %1119 = vsyncpa [#allocation6], 1 }
 0x326   :  { %1120 = vsyncpa [#allocation4], 1 }
 0x327   :  { %1122 = vsyncpa [#allocation4 + $0x1], 1 }

// kernel: tpu_custom_call.1
= control target key start
LH: loop header
LB: loop body
LE: loop exit
PB: predicated region body
PF: predicated region fallthrough
CT: control target
= control target key end

     0   :  { %10 = vsyncpa [#allocation3], 0  ;;  %s2201_s0 = inlined_call_operand.hbm [shape: f32[256,256], index: 0, kind: input, shape index: {}]   ;;  %s2202_s1 = inlined_call_operand.hbm [shape: bf16[256,256], index: 1, kind: input, shape index: {}]   ;;  %s2203_s2 = inlined_call_operand.vmem [shape: f32[1,256], index: 2, kind: input, shape index: {}]   ;;  %s2204_s3 = inlined_call_operand.hbm [shape: bf16[256,128], index: 3, kind: input, shape index: {}]   ;;  %s2205_s4 = inlined_call_operand.vmem [shape: f32[1,128], index: 4, kind: input, shape index: {}]   ;;  %s2206_s5 = inlined_call_operand.hbm [shape: f32[256,128], index: 5, kind: output, shape index: {}]  }
   0x1   :  { %12 = vsyncpa [#allocation3 + $0x1], 0 }
   0x2   :  { %13 = vsyncpa [#allocation6], 0 }
   0x3   :  { %14 = vsyncpa [#allocation4], 0 }
   0x4   :  { %16 = vsyncpa [#allocation4 + $0x1], 0  ;;  %s1693_s18 = smov 0   ;;  %s1695_s19 = smov 0  }
   0x5   :  { %s1697_s20 = smov 0   ;;  %s1699_s21 = smov 0  }
   0x6 LB: > { %s1714_s22 = sadd.s32 4294967295, %s1649_s21   ;;  %s1187_s23 = sadd.s32 4294967294, %s1649_s21   ;;  %s1649_s21 = sphi %s1699_s21, %s2226_s21   ;;  %s1645_s20 = sphi %s1697_s20, %s2225_s20   ;;  %s1641_s19 = sphi %s1695_s19, %s2224_s19   ;;  %s1637_s18 = sphi %s1693_s18, %s2223_s18  }
   0x7   : > { %p42_p0 = scmp.ne.s32.totalorder %s1641_s19, %s1637_s18  ;;  %p2207_p1 = scmp.eq.s32.totalorder %s1714_s22, 0 }
   0x8   : > { %p156_p3 = scmp.eq.s32.totalorder %s1187_s23, 1  ;;  %p1188_p5 = scmp.ge.s32.totalorder %s1649_s21, 1 }
   0x9   : > { %p1723_p4 = por %p2207_p1, %p42_p0  ;;  %p163_p7 = scmp.lt.s32.totalorder %s1649_s21, 3 }
   0xa   : > { %p1728_p6 = por %p156_p3, %p42_p0  ;;  %s1651_s27 = smov [#allocation5]  }
   0xb   : > { %s2210_s24 = scalar_select %p1723_p4, 1, 0 }
   0xc   : > { %s2211_s25 = scalar_select %p1728_p6, 1, 0 }
   0xd   : > { %p1733_p8 = pnand %p1188_p5, %p163_p7  ;;  %s175_s28 = sshll.u32 %s1651_s27, 4  ;;  %s1737_s28 = int_to_ptr.vmem [resolvable:$true] %s175_s28 }
   0xe   : > { %s1652_s30 = smov [#allocation7]   ;;  %s1493_s9 = scalar_lea.hbm %s2202_s1, 4096 }
   0xf   : > { %p1334_p9 = pneg %p1733_p8  ;;  %s191_s6 = sshll.u32 %s1652_s30, 4  ;;  %s1748_s6 = int_to_ptr.vmem [resolvable:$true] %s191_s6 }
  0x10   : > { %p1494_p12 = scmp.ne.s32.totalorder %s2202_s1, %s1493_s9  ;;  %p1500_p5 = scmp.lt.u32.totalorder %s1493_s9, %s2202_s1 }
  0x11   : > { %p1744_p11 = pnand %p1334_p9, %p2207_p1 }
  0x13   : > { %p1495_p13 = pneg %p1744_p11 }
  0x15   : > { %p1496_p0 = pnand %p1495_p13, %p1494_p12 }
  0x17   : > { %p1497_p3 = pneg %p1496_p0 }
  0x19   : > { %p1502_p7 = pnand %p1500_p5, %p1497_p3 }
  0x1b   : > { %1505 = shalt.err (!%p1502_p7)
}
  0x1c   : > { %s1506_s14 = scalar_lea.vmem %s1737_s28, 4096  ;;  %p1514_p2 = scmp.lt.s32.totalorder %s1737_s28, %s1737_s28 }
  0x1d   : > { %p1507_p9 = scmp.ne.s32.totalorder %s1737_s28, %s1506_s14  ;;  %p1515_p12 = scmp.lt.s32.totalorder %s1506_s14, %s1506_s14 }
  0x1f   : > { %p1509_p10 = pnand %p1507_p9, %p1495_p13  ;;  %p1516_p0 = por %p1515_p12, %p1514_p2 }
  0x21   : > { %p1510_p1 = pneg %p1509_p10 }
  0x23   : > { %p1517_p6 = pnand %p1516_p0, %p1510_p1 }
  0x25   : > { %1520 = shalt.err (!%p1517_p6)
}
  0x26   : > { %s1653_s15 = smov 128   ;;  %s1654_s16 = smov 8  }
  0x27   : > { %1337 = dma.hbm_to_vmem [thread:$0]  (!%p1744_p11), %s2202_s1, 4096, %s1737_s28, [#allocation6], %s1653_s15, %s1653_s15, %s1654_s16  }
  0x28   : > { %s1521_s7 = scalar_lea.hbm %s2204_s3, 2048 }
  0x29   : > { %p1522_p2 = scmp.ne.s32.totalorder %s2204_s3, %s1521_s7  ;;  %p1528_p10 = scmp.lt.u32.totalorder %s1521_s7, %s2204_s3 }
  0x2b   : > { %p1524_p1 = pnand %p1522_p2, %p1495_p13 }
  0x2d   : > { %p1525_p6 = pneg %p1524_p1 }
  0x2f   : > { %p1530_p3 = pnand %p1528_p10, %p1525_p6 }
  0x31   : > { %1533 = shalt.err (!%p1530_p3)
}
  0x32   : > { %s1534_s28 = scalar_lea.vmem %s1748_s6, 2048  ;;  %p1542_p12 = scmp.lt.s32.totalorder %s1748_s6, %s1748_s6 }
  0x33   : > { %p1535_p5 = scmp.ne.s32.totalorder %s1748_s6, %s1534_s28  ;;  %p1543_p0 = scmp.lt.s32.totalorder %s1534_s28, %s1534_s28 }
  0x35   : > { %p1537_p7 = pnand %p1535_p5, %p1495_p13  ;;  %p1544_p2 = por %p1543_p0, %p1542_p12 }
  0x37   : > { %p1538_p9 = pneg %p1537_p7 }
  0x39   : > { %p1545_p1 = pnand %p1544_p2, %p1538_p9 }
  0x3b   : > { %1548 = shalt.err (!%p1545_p1)
}
  0x3c   : > { %s1655_s12 = smov 64   ;;  %s1656_s13 = smov 4  }
  0x3d   : > { %1340 = dma.hbm_to_vmem [thread:$0]  (!%p1744_p11), %s2204_s3, 2048, %s1748_s6, [#allocation6], %s1655_s12, %s1655_s12, %s1656_s13  }
  0x3e   : > { %s1803_s16 = sadd.s32 1, %s1649_s21   ;;  %s29_s23 = sadd.s32 1, %s1645_s20 }
  0x3f   : > { %s26_s17 = ssub.s32 %s1649_s21, %s1803_s16  ;;  %p36_p6 = scmp.ne.s32.totalorder %s1645_s20, %s1641_s19 }
  0x40   : > { %p27_p13 = scmp.eq.s32.totalorder %s26_s17, 0  ;;  %p37_p10 = scmp.eq.s32.totalorder %s1649_s21, 0 }
  0x41   : > { %p2214_p5 = scmp.eq.s32.totalorder %s1714_s22, 1  ;;  %p1351_p9 = scmp.lt.s32.totalorder %s1649_s21, 2 }
  0x42   : > { %s1812_s27 = scalar_select %p27_p13, %s1645_s20, %s29_s23  }
  0x43   : > { %p38_p3 = por %p37_p10, %p36_p6  ;;  %p1816_p7 = por %p2214_p5, %p36_p6 }
  0x44   : > { %s208_s29 = sand.u32 1, %s1645_s20   ;;  %s1256_s6 = sshll.u32 %s1649_s21, 12 }
  0x45   : > { %s2215_s30 = scalar_select %p1816_p7, 1, 0 }
  0x46   : > { %s1192_s7 = sshll.u32 %s208_s29, 8  ;;  %s1826_s10 = scalar_lea.hbm %s2201_s0, %s1256_s6 }
  0x47   : > { %s212_s11 = scalar_lea.vmem [#allocation2], %s1192_s7  ;;  %p1830_p11 = pnand %p1351_p9, %p38_p3 }
  0x48   : > { %s220_s28 = sshll.u32 %s212_s11, 4  ;;  %s1834_s13 = scalar_lea.sflag [#allocation3], %s208_s29  ;;  %s1828_s28 = int_to_ptr.vmem [resolvable:$true] %s220_s28 }
  0x49   : > { %s1549_s14 = scalar_lea.hbm %s1826_s10, 4096  ;;  %p1551_p0 = pneg %p1830_p11 }
  0x4a   : > { %p1550_p12 = scmp.ne.s32.totalorder %s1826_s10, %s1549_s14  ;;  %s1554_s23 = scalar_lea.hbm %s2201_s0, 8192 }
  0x4b   : > { %p1555_p13 = scmp.lt.u32.totalorder %s1826_s10, %s2201_s0  ;;  %p1556_p6 = scmp.lt.u32.totalorder %s1554_s23, %s1549_s14 }
  0x4c   : > { %p1552_p2 = pnand %p1551_p0, %p1550_p12  ;;  %p1558_p3 = scmp.lt.u32.totalorder %s1549_s14, %s1826_s10 }
  0x4d   : > { %p1557_p10 = por %p1556_p6, %p1555_p13 }
  0x4e   : > { %p1553_p1 = pneg %p1552_p2 }
  0x4f   : > { %p1559_p5 = por %p1558_p3, %p1557_p10 }
  0x51   : > { %p1560_p9 = pnand %p1559_p5, %p1553_p1 }
  0x53   : > { %1563 = shalt.err (!%p1560_p9)
}
  0x54   : > { %s1564_s29 = scalar_lea.vmem %s1828_s28, 4096  ;;  %s1657_s8 = smov [#allocation2]  }
  0x55   : > { %p1565_p12 = scmp.ne.s32.totalorder %s1828_s28, %s1564_s29  ;;  %s1569_s9 = sshll.u32 %s1657_s8, 4  ;;  %s1570_s9 = int_to_ptr.vmem [resolvable:$false] %s1569_s9 }
  0x56   : > { %s1571_s11 = scalar_lea.vmem %s1570_s9, 8192  ;;  %p1572_p4 = scmp.lt.s32.totalorder %s1828_s28, %s1570_s9 }
  0x57   : > { %p1567_p2 = pnand %p1565_p12, %p1551_p0  ;;  %p1573_p13 = scmp.lt.s32.totalorder %s1571_s11, %s1564_s29 }
  0x59   : > { %p1568_p7 = pneg %p1567_p2  ;;  %p1574_p6 = por %p1573_p13, %p1572_p4 }
  0x5b   : > { %p1575_p10 = pnand %p1574_p6, %p1568_p7 }
  0x5d   : > { %1578 = shalt.err (!%p1575_p10)
}
  0x5e   : > { %s1658_s14 = smov 256   ;;  %s1659_s15 = smov 16  }
  0x5f   : > { %1344 = dma.hbm_to_vmem [thread:$0]  (!%p1830_p11), %s1826_s10, 4096, %s1828_s28, %s1834_s13, %s1658_s14, %s1658_s14, %s1659_s15  }
  0x60   : > { %232 = sbr.rel (%p1733_p8) target bundleno = 788 (0x314), region = 40  ;;  %s1865_s17 = sand.u32 (!%p1733_p8), 1, %s1641_s19  }
  0x61   : > { %s1197_s23 = sshll.u32 (!%p1733_p8), %s1865_s17, 8  ;;  %s235_s7 = scalar_lea.sflag (!%p1733_p8), [#allocation3], %s1865_s17 }
  0x62   : > { %s1869_s6 = scalar_lea.vmem (!%p1733_p8), [#allocation2], %s1197_s23  ;;  %p2217_p4 = scmp.ne.s32.totalorder (!%p1733_p8), %s2210_s24, 0 }
  0x67   : > { %1624 = dma.done.wait (%p2217_p4), %s235_s7, 4096  }
  0x68   : > { %1626 = vsyncadd (%p2217_p4), %s235_s7, 4294963200  ;;  %p2218_p7 = scmp.eq.s32.totalorder %s1714_s22, 0 }
  0x6a   : > { %1628 = dma.done.wait (%p2218_p7), [#allocation6], 6144   ;;  %p2219_p8 = pmov %p2218_p7 }
  0x6b   : > { %v1880_v0 = vld [vmem:[%s1869_s6] sm:$0xff]  ;;  %v1883_v1 = vld [vmem:[%s1869_s6 + $0x8] sm:$0xff]  ;;  %v1898_v7 = vld [vmem:[%s1869_s6 + $0x10] sm:$0xff]  ;;  %s1200_s10 = sshll.u32 %s1865_s17, 7  ;;  %s1257_s29 = sshll.u32 %s1714_s22, 11 }
  0x6c   : > { %1630 = vsyncadd (%p2219_p8), [#allocation6], 4294961152  ;;  %v1886_v2 = vld [vmem:[%s1869_s6 + $0x20] sm:$0xff]  ;;  %v308_v3 = vmul.f32 %v1880_v0, %v1880_v0  ;;  %v309_v4 = vmul.f32 %v1883_v1, %v1883_v1  ;;  %v1893_v5 = vld [vmem:[%s1869_s6 + $0x28] sm:$0xff]  ;;  %v310_v10 = vmul.f32 %v1898_v7, %v1898_v7  ;;  %s2117_s13 = scalar_lea.vmem [#allocation8], %s1200_s10  ;;  %s2152_s14 = scalar_lea.hbm %s2206_s5, %s1257_s29 }
  0x6d   : > { %v312_v6 = vmul.f32 %v1886_v2, %v1886_v2  ;;  %v1901_v8 = vld [vmem:[%s1869_s6 + $0x18] sm:$0xff]  ;;  %v313_v9 = vmul.f32 %v1893_v5, %v1893_v5  ;;  %v1910_v12 = vld [vmem:[%s1869_s6 + $0x30] sm:$0xff]  ;;  %v1926_v19 = vld [vmem:[%s1869_s6 + $0x40] sm:$0xff]  ;;  %s1095_s8 = sshll.u32 %s2117_s13, 4  ;;  %s1082_s22 = scalar_lea.sflag [#allocation4], %s1865_s17  ;;  %s2154_s8 = int_to_ptr.vmem [resolvable:$true] %s1095_s8 }
  0x6e   : > { %v311_v11 = vmul.f32 %v1901_v8, %v1901_v8  ;;  %v1913_v13 = vld [vmem:[%s1869_s6 + $0x38] sm:$0xff]  ;;  %v1916_v14 = vld [vmem:[%s1869_s6 + $0x50] sm:$0xff]  ;;  %v340_v15 = vadd.f32 %v309_v4, %v308_v3  ;;  %v314_v16 = vmul.f32 %v1910_v12, %v1910_v12  ;;  %v1929_v20 = vld [vmem:[%s1869_s6 + $0x48] sm:$0xff]  ;;  %v316_v23 = vmul.f32 %v1926_v19, %v1926_v19  ;;  %s1579_s15 = scalar_lea.vmem %s2154_s8, 2048  ;;  %p2220_p0 = scmp.ne.s32.totalorder %s2215_s30, 0 }
  0x6f   : > { %v315_v17 = vmul.f32 %v1913_v13, %v1913_v13  ;;  %v1923_v18 = vld [vmem:[%s1869_s6 + $0x58] sm:$0xff]  ;;  %v346_v21 = vadd.f32 %v313_v9, %v312_v6  ;;  %v317_v24 = vmul.f32 %v1929_v20, %v1929_v20  ;;  %v318_v26 = vmul.f32 %v1916_v14, %v1916_v14  ;;  %v1940_v28 = vld [vmem:[%s1869_s6 + $0x60] sm:$0xff]  ;;  %v1943_v29 = vld [vmem:[%s1869_s6 + $0x68] sm:$0xff]  ;;  %p1580_p11 = scmp.ne.s32.totalorder %s2154_s8, %s1579_s15  ;;  %s1660_s23 = smov [#allocation8]  }
  0x70   : > { %341 = vadd.xlane.f32.xlu0 %v340_v15  ;;  %v343_v22 = vadd.f32 %v311_v11, %v310_v10  ;;  %v319_v27 = vmul.f32 %v1923_v18, %v1923_v18  ;;  %v1946_v30 = vld [vmem:[%s1869_s6 + $0x70] sm:$0xff]  ;;  %v1949_v31 = vld [vmem:[%s1869_s6 + $0x78] sm:$0xff]  ;;  %v320_v33 = vmul.f32 %v1940_v28, %v1940_v28  ;;  %v321_v34 = vmul.f32 %v1943_v29, %v1943_v29  ;;  %v1966_v40 = vld [vmem:[%s1869_s6 + $0x80] sm:$0xff]  ;;  %s1583_s7 = sshll.u32 %s1660_s23, 4  ;;  %s1584_s7 = int_to_ptr.vmem [resolvable:$false] %s1583_s7 }
  0x71   : > { %347 = vadd.xlane.f32.xlu1 %v346_v21  ;;  %v349_v25 = vadd.f32 %v315_v17, %v314_v16  ;;  %v352_v32 = vadd.f32 %v317_v24, %v316_v23  ;;  %v1956_v35 = vld [vmem:[%s1869_s6 + $0x90] sm:$0xff]  ;;  %v1959_v36 = vld [vmem:[%s1869_s6 + $0x98] sm:$0xff]  ;;  %v322_v38 = vmul.f32 %v1946_v30, %v1946_v30  ;;  %v323_v39 = vmul.f32 %v1949_v31, %v1949_v31  ;;  %v1969_v41 = vld [vmem:[%s1869_s6 + $0x88] sm:$0xff]  ;;  %p1581_p1 = pnand %p1580_p11, %p2220_p0  ;;  %p1586_p5 = scmp.lt.s32.totalorder %s2154_s8, %s1584_s7 }
  0x72   : > { %v355_v37 = vadd.f32 %v319_v27, %v318_v26  ;;  %v1397_v42 = vld [vmem:[#allocation5 + $0x4] ss:$8 sps:$4 sm:$0xff]   ;;  %v1399_v43 = vld [vmem:[#allocation5] ss:$8 sps:$4 sm:$0xff]   ;;  %v1400_v44 = vld [vmem:[#allocation5 + $0x14] ss:$8 sps:$4 sm:$0xff]   ;;  %v358_v45 = vadd.f32 %v321_v34, %v320_v33  ;;  %v324_v46 = vmul.f32 %v1966_v40, %v1966_v40  ;;  %v325_v47 = vmul.f32 %v1969_v41, %v1969_v41 }
  0x73   : > { %v1976_v48 = vld [vmem:[%s1869_s6 + $0xb0] sm:$0xff]  ;;  %v1979_v49 = vld [vmem:[%s1869_s6 + $0xa0] sm:$0xff]  ;;  %672 = vmatprep.subr.bf16.mxu0 %v1397_v42  ;;  %v361_v50 = vadd.f32 %v323_v39, %v322_v38  ;;  %v326_v51 = vmul.f32 %v1956_v35, %v1956_v35  ;;  %v327_v52 = vmul.f32 %v1959_v36, %v1959_v36  ;;  %v1986_v53 = vld [vmem:[%s1869_s6 + $0xa8] sm:$0xff]  ;;  %p1582_p3 = pneg %p1581_p1 }
  0x74   : > { %344 = vadd.xlane.f32.xlu0 %v343_v22  ;;  %673 = vmatpush1.bf16.msra.mxu0 %v1399_v43  ;;  %v1402_v54 = vld [vmem:[#allocation5 + $0x10] ss:$8 sps:$4 sm:$0xff]   ;;  %v1403_v56 = vld [vmem:[#allocation5 + $0x24] ss:$8 sps:$4 sm:$0xff]   ;;  %v364_v57 = vadd.f32 %v325_v47, %v324_v46  ;;  %v328_v58 = vmul.f32 %v1979_v49, %v1979_v49  ;;  %v329_v59 = vmul.f32 %v1986_v53, %v1986_v53  ;;  %v1405_v6 = vld [vmem:[#allocation5 + $0x20] ss:$8 sps:$4 sm:$0xff]  }
  0x75   : > { %350 = vadd.xlane.f32.xlu1 %v349_v25  ;;  %v1989_v55 = vld [vmem:[%s1869_s6 + $0xb8] sm:$0xff]  ;;  %674 = vmatprep.subr.bf16.mxu0 %v1400_v44  ;;  %v1996_v60 = vld [vmem:[%s1869_s6 + $0xd0] sm:$0xff]  ;;  %v1999_v61 = vld [vmem:[%s1869_s6 + $0xc0] sm:$0xff]  ;;  %v367_v62 = vadd.f32 %v327_v52, %v326_v51  ;;  %v330_v63 = vmul.f32 %v1976_v48, %v1976_v48 }
  0x76   : > { %v331_v3 = vmul.f32 %v1989_v55, %v1989_v55  ;;  %v2006_v4 = vld [vmem:[%s1869_s6 + $0xc8] sm:$0xff]  ;;  %v2009_v9 = vld [vmem:[%s1869_s6 + $0xd8] sm:$0xff]  ;;  %v370_v11 = vadd.f32 %v329_v59, %v328_v58  ;;  %v332_v15 = vmul.f32 %v1999_v61, %v1999_v61  ;;  %v2016_v17 = vld [vmem:[%s1869_s6 + $0xf0] sm:$0xff]  ;;  %v334_v23 = vmul.f32 %v1996_v60, %v1996_v60 }
  0x77   : > { %v1406_v10 = vld [vmem:[#allocation5 + $0x34] ss:$8 sps:$4 sm:$0xff]   ;;  %v333_v16 = vmul.f32 %v2006_v4, %v2006_v4  ;;  %v2019_v21 = vld [vmem:[%s1869_s6 + $0xe0] sm:$0xff]  ;;  %v335_v24 = vmul.f32 %v2009_v9, %v2009_v9  ;;  %v2026_v25 = vld [vmem:[%s1869_s6 + $0xe8] sm:$0xff]  ;;  %v338_v39 = vmul.f32 %v2016_v17, %v2016_v17 }
  0x78   : > { %353 = vadd.xlane.f32.xlu0 %v352_v32  ;;  %675 = vmatpush1.bf16.msra.mxu0 %v1402_v54  ;;  %v373_v22 = vadd.f32 %v331_v3, %v330_v63  ;;  %v1408_v26 = vld [vmem:[#allocation5 + $0x30] ss:$8 sps:$4 sm:$0xff]   ;;  %v1409_v32 = vld [vmem:[#allocation5 + $0x44] ss:$8 sps:$4 sm:$0xff]   ;;  %v336_v34 = vmul.f32 %v2019_v21, %v2019_v21  ;;  %v1411_v43 = vld [vmem:[#allocation5 + $0x40] ss:$8 sps:$4 sm:$0xff]  }
  0x79   : > { %356 = vadd.xlane.f32.xlu1 %v355_v37  ;;  %676 = vmatprep.subr.bf16.mxu0 %v1403_v56  ;;  %v2029_v27 = vld [vmem:[%s1869_s6 + $0xf8] sm:$0xff]  ;;  %v376_v33 = vadd.f32 %v333_v16, %v332_v15  ;;  %v337_v37 = vmul.f32 %v2026_v25, %v2026_v25  ;;  %v379_v38 = vadd.f32 %v335_v24, %v334_v23  ;;  %v1417_v51 = vld [vmem:[#allocation5 + $0x60] ss:$8 sps:$4 sm:$0xff]   ;;  %v1421_v56 = vld [vmem:[#allocation5 + $0x84] ss:$8 sps:$4 sm:$0xff]   ;;  %s1585_s6 = scalar_lea.vmem %s1584_s7, 4096 }
  0x7a   : > { %v339_v42 = vmul.f32 %v2029_v27, %v2029_v27  ;;  %v1412_v44 = vld [vmem:[#allocation5 + $0x54] ss:$8 sps:$4 sm:$0xff]   ;;  %v1414_v47 = vld [vmem:[#allocation5 + $0x50] ss:$8 sps:$4 sm:$0xff]   ;;  %v1429_v63 = vld [vmem:[#allocation5 + $0xa0] ss:$8 sps:$4 sm:$0xff]   ;;  %p1587_p9 = scmp.lt.s32.totalorder %s1585_s6, %s1579_s15 }
  0x7b   : > { %v1418_v52 = vld [vmem:[#allocation5 + $0x74] ss:$8 sps:$4 sm:$0xff]   ;;  %v1420_v54 = vld [vmem:[#allocation5 + $0x70] ss:$8 sps:$4 sm:$0xff]   ;;  %v1441_v23 = vld [vmem:[#allocation5 + $0xe0] ss:$8 sps:$4 sm:$0xff]  }
  0x7c   : > { %359 = vadd.xlane.f32.xlu0 %v358_v45  ;;  %677 = vmatpush1.bf16.msra.mxu0 %v1405_v6  ;;  %v382_v45 = vadd.f32 %v337_v37, %v336_v34  ;;  %v385_v46 = vadd.f32 %v339_v42, %v338_v39  ;;  %v1424_v58 = vld [vmem:[#allocation5 + $0x94] ss:$8 sps:$4 sm:$0xff]   ;;  %v1426_v59 = vld [vmem:[#allocation5 + $0x90] ss:$8 sps:$4 sm:$0xff]   ;;  %v1447_v34 = vld [vmem:[#allocation7 + $0x48] sm:$0xff]   ;;  %p1588_p12 = por %p1587_p9, %p1586_p5 }
  0x7d   : > { %362 = vadd.xlane.f32.xlu1 %v361_v50  ;;  %678 = vmatprep.subr.bf16.mxu0 %v1406_v10  ;;  %v1415_v50 = vld [vmem:[#allocation5 + $0x64] ss:$8 sps:$4 sm:$0xff]   ;;  %v1430_v3 = vld [vmem:[#allocation5 + $0xb4] ss:$8 sps:$4 sm:$0xff]   ;;  %v1432_v6 = vld [vmem:[#allocation5 + $0xb0] ss:$8 sps:$4 sm:$0xff]  }
  0x7e   : > { %v1433_v10 = vld [vmem:[#allocation5 + $0xc4] ss:$8 sps:$4 sm:$0xff]   ;;  %v1436_v15 = vld [vmem:[#allocation5 + $0xd4] ss:$8 sps:$4 sm:$0xff]   ;;  %v1438_v16 = vld [vmem:[#allocation5 + $0xd0] ss:$8 sps:$4 sm:$0xff]   ;;  %p1589_p2 = pnand %p1588_p12, %p1582_p3 }
  0x7f   : > { %v1442_v24 = vld [vmem:[#allocation5 + $0xf4] ss:$8 sps:$4 sm:$0xff]   ;;  %v1448_v37 = vld [vmem:[#allocation7 + $0x8] sm:$0xff]  }
  0x80   : > { %365 = vadd.xlane.f32.xlu0 %v364_v57  ;;  %679 = vmatpush1.bf16.msra.mxu0 %v1408_v26  ;;  %v1423_v57 = vld [vmem:[#allocation5 + $0x80] ss:$8 sps:$4 sm:$0xff]   ;;  %v1444_v26 = vld [vmem:[#allocation5 + $0xf0] ss:$8 sps:$4 sm:$0xff]  }
  0x81   : > { %368 = vadd.xlane.f32.xlu1 %v367_v62  ;;  %680 = vmatprep.subr.bf16.mxu0 %v1409_v32  ;;  %v1427_v62 = vld [vmem:[#allocation5 + $0xa4] ss:$8 sps:$4 sm:$0xff]   ;;  %v1450_v39 = vld [vmem:[#allocation7 + $0x10] sm:$0xff]   ;;  %v1451_v42 = vld [vmem:[#allocation7 + $0x58] sm:$0xff]  }
  0x82   : > { %v1445_v32 = vld [vmem:[#allocation7 + $0x40] sm:$0xff]  }
  0x83   : > { %1258 = vmatprep.subr.bf16.mxu1 %v1445_v32 }
  0x84   : > { %371 = vadd.xlane.f32.xlu0 %v370_v11  ;;  %681 = vmatpush1.bf16.msra.mxu0 %v1411_v43  ;;  %v1435_v11 = vld [vmem:[#allocation5 + $0xc0] ss:$8 sps:$4 sm:$0xff]   ;;  %v1452_v43 = vld [vmem:[#allocation7 + $0x18] sm:$0xff]  }
  0x85   : > { %374 = vadd.xlane.f32.xlu1 %v373_v22  ;;  %682 = vmatprep.subr.bf16.mxu0 %v1412_v44  ;;  %v1439_v22 = vld [vmem:[#allocation5 + $0xe4] ss:$8 sps:$4 sm:$0xff]  }
  0x86   : > { %v1453_v44 = vld [vmem:[#allocation7 + $0x60] sm:$0xff]  }
  0x88   : > { %377 = vadd.xlane.f32.xlu0 %v376_v33  ;;  %683 = vmatpush1.bf16.msra.mxu0 %v1414_v47  ;;  %v1446_v33 = vld [vmem:[#allocation7] sm:$0xff]  }
  0x89   : > { %380 = vadd.xlane.f32.xlu1 %v379_v38  ;;  %684 = vmatprep.subr.bf16.mxu0 %v1415_v50  ;;  %v1449_v38 = vld [vmem:[#allocation7 + $0x50] sm:$0xff]  }
  0x8a   : > { %1259 = vmatpush3.bf16.msra.mxu1 %v1446_v33 }
  0x8b   : > { %1260 = vmatprep.subr.bf16.mxu1 %v1447_v34 }
  0x8c   : > { %383 = vadd.xlane.f32.xlu0 %v382_v45  ;;  %685 = vmatpush1.bf16.msra.mxu0 %v1417_v51  ;;  %v1454_v45 = vld [vmem:[#allocation7 + $0x20] sm:$0xff]  }
  0x8d   : > { %386 = vadd.xlane.f32.xlu1 %v385_v46  ;;  %686 = vmatprep.subr.bf16.mxu0 %v1418_v52  ;;  %v1455_v46 = vld [vmem:[#allocation7 + $0x68] sm:$0xff]  }
  0x8e   : > { %1261 = vmatpush3.bf16.msra.mxu1 %v1448_v37 }
  0x8f   : > { %1262 = vmatprep.subr.bf16.mxu1 %v1449_v38 }
  0x90   : > { %687 = vmatpush1.bf16.msra.mxu0 %v1420_v54 }
  0x91   : > { %688 = vmatprep.subr.bf16.mxu0 %v1421_v56 }
  0x92   : > { %1263 = vmatpush3.bf16.msra.mxu1 %v1450_v39 }
  0x93   : > { %1264 = vmatprep.subr.bf16.mxu1 %v1451_v42 }
  0x94   : > { %689 = vmatpush1.bf16.msra.mxu0 %v1423_v57 }
  0x95   : > { %690 = vmatprep.subr.bf16.mxu0 %v1424_v58 }
  0x96   : > { %1265 = vmatpush3.bf16.msra.mxu1 %v1452_v43 }
  0x97   : > { %1266 = vmatprep.subr.bf16.mxu1 %v1453_v44 }
  0x98   : > { %691 = vmatpush1.bf16.msra.mxu0 %v1426_v59 }
  0x99   : > { %692 = vmatprep.subr.bf16.mxu0 %v1427_v62 }
  0x9a   : > { %1267 = vmatpush3.bf16.msra.mxu1 %v1454_v45 }
  0x9b   : > { %1268 = vmatprep.subr.bf16.mxu1 %v1455_v46 }
  0x9c   : > { %693 = vmatpush1.bf16.msra.mxu0 %v1429_v63 }
  0x9d   : > { %694 = vmatprep.subr.bf16.mxu0 %v1430_v3 }
  0xa0   : > { %695 = vmatpush1.bf16.msra.mxu0 %v1432_v6 }
  0xa1   : > { %696 = vmatprep.subr.bf16.mxu0 %v1433_v10 }
  0xa4   : > { %697 = vmatpush1.bf16.msra.mxu0 %v1435_v11 }
  0xa5   : > { %698 = vmatprep.subr.bf16.mxu0 %v1436_v15 }
  0xa8   : > { %699 = vmatpush1.bf16.msra.mxu0 %v1438_v16 }
  0xa9   : > { %700 = vmatprep.subr.bf16.mxu0 %v1439_v22 }
  0xac   : > { %701 = vmatpush1.bf16.msra.mxu0 %v1441_v23 }
  0xad   : > { %702 = vmatprep.subr.bf16.mxu0 %v1442_v24 }
  0xb0   : > { %703 = vmatpush1.bf16.msra.mxu0 %v1444_v26 }
  0xfd   : > { %v342_v47 = vpop.xlane.xlu0 %341 }
  0xfe   : > { %v388_v50 = vmax.f32 %v342_v47, 1e-24  ;;  %v348_v51 = vpop.xlane.xlu1 %347 }
  0xff   : > { %v390_v52 = vmax.f32 %v348_v51, 1e-24 }
 0x100   : > { %1461 = vrsqrt.f32 %v388_v50 }
 0x101   : > { %1463 = vrsqrt.f32 %v390_v52  ;;  %v345_v54 = vpop.xlane.xlu0 %344 }
 0x102   : > { %v389_v56 = vmax.f32 %v345_v54, 1e-24  ;;  %v351_v57 = vpop.xlane.xlu1 %350 }
 0x103   : > { %v391_v58 = vmax.f32 %v351_v57, 1e-24 }
 0x104   : > { %1465 = vrsqrt.f32 %v389_v56 }
 0x105   : > { %1467 = vrsqrt.f32 %v391_v58  ;;  %v354_v59 = vpop.xlane.xlu0 %353 }
 0x106   : > { %v357_v62 = vpop.xlane.xlu1 %356  ;;  %v392_v63 = vmax.f32 %v354_v59, 1e-24 }
 0x107   : > { %v393_v3 = vmax.f32 %v357_v62, 1e-24 }
 0x108   : > { %1469 = vrsqrt.f32 %v392_v63 }
 0x109   : > { %1471 = vrsqrt.f32 %v393_v3  ;;  %v360_v6 = vpop.xlane.xlu0 %359 }
 0x10a   : > { %v1462_v10 = vpop.eup %1461  ;;  %v363_v11 = vpop.xlane.xlu1 %362  ;;  %v394_v16 = vmax.f32 %v360_v6, 1e-24 }
 0x10b   : > { %v1464_v15 = vpop.eup %1463  ;;  %v395_v22 = vmax.f32 %v363_v11, 1e-24  ;;  %v421_v24 = vmul.f32 %v1462_v10, %v1883_v1  ;;  %v420_v34 = vmul.f32 %v1462_v10, %v1880_v0 }
 0x10c   : > { %v425_v26 = vmul.f32 %v1464_v15, %v1893_v5  ;;  %1473 = vrsqrt.f32 %v394_v16 }
 0x10d   : > { %1475 = vrsqrt.f32 %v395_v22  ;;  %v366_v39 = vpop.xlane.xlu0 %365 }
 0x10e   : > { %v1466_v23 = vpop.eup %1465  ;;  %v369_v44 = vpop.xlane.xlu1 %368  ;;  %v396_v5 = vmax.f32 %v366_v39, 1e-24 }
 0x10f   : > { %v1468_v32 = vpop.eup %1467  ;;  %v423_v33 = vmul.f32 %v1466_v23, %v1901_v8  ;;  %v422_v37 = vmul.f32 %v1466_v23, %v1898_v7  ;;  %v397_v47 = vmax.f32 %v369_v44, 1e-24  ;;  %v424_v8 = vmul.f32 %v1464_v15, %v1886_v2 }
 0x110   : > { %v427_v38 = vmul.f32 %v1468_v32, %v1913_v13  ;;  %v426_v13 = vmul.f32 %v1468_v32, %v1910_v12  ;;  %1477 = vrsqrt.f32 %v396_v5 }
 0x111   : > { %v453_v42 = vpack.c.bf16 %v423_v33, %v421_v24  ;;  %v452_v43 = vpack.c.bf16 %v422_v37, %v420_v34  ;;  %1479 = vrsqrt.f32 %v397_v47  ;;  %v372_v50 = vpop.xlane.xlu0 %371 }
 0x112   : > { %v1470_v45 = vpop.eup %1469  ;;  %v455_v46 = vpack.c.bf16 %v427_v38, %v425_v26  ;;  %v375_v54 = vpop.xlane.xlu1 %374  ;;  %v454_v57 = vpack.c.bf16 %v426_v13, %v424_v8  ;;  %v398_v58 = vmax.f32 %v372_v50, 1e-24  ;;  %v1456_v13 = vld [vmem:[#allocation7 + $0x28] sm:$0xff]   ;;  %v1458_v50 = vld [vmem:[#allocation7 + $0x30] sm:$0xff]  }
 0x113   : > { %v1472_v1 = vpop.eup %1471  ;;  %704 = vmatprep.mubr.bf16.mxu0 %v453_v42  ;;  %v429_v0 = vmul.f32 %v1470_v45, %v1929_v20  ;;  %v428_v59 = vmul.f32 %v1470_v45, %v1926_v19  ;;  %v399_v62 = vmax.f32 %v375_v54, 1e-24  ;;  %1269 = vmatpush3.bf16.msra.mxu1 %v1456_v13 }
 0x114   : > { %705 = vmatmul.mubr.bf16.vlgmr.msra.gmra.mrb[0].mxu0 %v452_v43  ;;  %v431_v7 = vmul.f32 %v1472_v1, %v1923_v18  ;;  %v430_v20 = vmul.f32 %v1472_v1, %v1916_v14  ;;  %1481 = vrsqrt.f32 %v398_v58 }
 0x115   : > { %714 = vmatprep.mubr.bf16.mxu0 %v455_v46  ;;  %1483 = vrsqrt.f32 %v399_v62  ;;  %v378_v63 = vpop.xlane.xlu0 %377 }
 0x116   : > { %v1474_v51 = vpop.eup %1473  ;;  %v457_v52 = vpack.c.bf16 %v431_v7, %v429_v0  ;;  %v456_v18 = vpack.c.bf16 %v430_v20, %v428_v59  ;;  %v381_v10 = vpop.xlane.xlu1 %380  ;;  %v400_v15 = vmax.f32 %v378_v63, 1e-24 }
 0x117   : > { %v1476_v56 = vpop.eup %1475  ;;  %v433_v2 = vmul.f32 %v1474_v51, %v1943_v29  ;;  %v432_v19 = vmul.f32 %v1474_v51, %v1940_v28  ;;  %v401_v16 = vmax.f32 %v381_v10, 1e-24 }
 0x118   : > { %v435_v12 = vmul.f32 %v1476_v56, %v1949_v31  ;;  %v434_v14 = vmul.f32 %v1476_v56, %v1946_v30  ;;  %1485 = vrsqrt.f32 %v400_v15 }
 0x119   : > { %1487 = vrsqrt.f32 %v401_v16  ;;  %v384_v23 = vpop.xlane.xlu0 %383 }
 0x11a   : > { %v1478_v3 = vpop.eup %1477  ;;  %v459_v6 = vpack.c.bf16 %v435_v12, %v433_v2  ;;  %v458_v22 = vpack.c.bf16 %v434_v14, %v432_v19  ;;  %v387_v32 = vpop.xlane.xlu1 %386  ;;  %v402_v34 = vmax.f32 %v384_v23, 1e-24 }
 0x11b   : > { %v1480_v11 = vpop.eup %1479  ;;  %v437_v29 = vmul.f32 %v1478_v3, %v1969_v41  ;;  %v436_v28 = vmul.f32 %v1478_v3, %v1966_v40  ;;  %v403_v37 = vmax.f32 %v387_v32, 1e-24 }
 0x11c   : > { %715 = vmatmul.mubr.bf16.gmra.mrb[4].mxu0 %v454_v57  ;;  %v439_v31 = vmul.f32 %v1480_v11, %v1959_v36  ;;  %v438_v30 = vmul.f32 %v1480_v11, %v1956_v35  ;;  %1489 = vrsqrt.f32 %v402_v34 }
 0x11d   : > { %724 = vmatprep.mubr.bf16.mxu0 %v457_v52  ;;  %1491 = vrsqrt.f32 %v403_v37 }
 0x11e   : > { %v1482_v24 = vpop.eup %1481  ;;  %v461_v26 = vpack.c.bf16 %v439_v31, %v437_v29  ;;  %v460_v38 = vpack.c.bf16 %v438_v30, %v436_v28 }
 0x11f   : > { %v1484_v33 = vpop.eup %1483  ;;  %v441_v41 = vmul.f32 %v1482_v24, %v1986_v53  ;;  %v440_v44 = vmul.f32 %v1482_v24, %v1979_v49 }
 0x120   : > { %v443_v36 = vmul.f32 %v1484_v33, %v1989_v55  ;;  %v442_v45 = vmul.f32 %v1484_v33, %v1976_v48 }
 0x122   : > { %v1486_v39 = vpop.eup %1485  ;;  %v463_v42 = vpack.c.bf16 %v443_v36, %v441_v41  ;;  %v462_v46 = vpack.c.bf16 %v442_v45, %v440_v44 }
 0x123   : > { %v1488_v43 = vpop.eup %1487  ;;  %v445_v35 = vmul.f32 %v1486_v39, %v2006_v4  ;;  %v444_v5 = vmul.f32 %v1486_v39, %v1999_v61  ;;  %v1457_v61 = vld [vmem:[#allocation7 + $0x70] sm:$0xff]  }
 0x124   : > { %725 = vmatmul.mubr.bf16.gmra.mrb[8].mxu0 %v456_v18  ;;  %v447_v40 = vmul.f32 %v1488_v43, %v2009_v9  ;;  %v446_v47 = vmul.f32 %v1488_v43, %v1996_v60  ;;  %1270 = vmatprep.subr.bf16.mxu1 %v1457_v61  ;;  %v1459_v60 = vld [vmem:[#allocation7 + $0x78] sm:$0xff]  }
 0x125   : > { %734 = vmatprep.mubr.bf16.mxu0 %v459_v6  ;;  %1271 = vmatpush3.bf16.msra.mxu1 %v1458_v50 }
 0x126   : > { %v1490_v53 = vpop.eup %1489  ;;  %v465_v1 = vpack.c.bf16 %v447_v40, %v445_v35  ;;  %v464_v48 = vpack.c.bf16 %v446_v47, %v444_v5  ;;  %1272 = vmatprep.subr.bf16.mxu1 %v1459_v60 }
 0x127   : > { %v1492_v55 = vpop.eup %1491  ;;  %v449_v0 = vmul.f32 %v1490_v53, %v2026_v25  ;;  %v448_v4 = vmul.f32 %v1490_v53, %v2019_v21  ;;  %v1460_v25 = vld [vmem:[#allocation7 + $0x38] sm:$0xff]  }
 0x128   : > { %v451_v49 = vmul.f32 %v1492_v55, %v2029_v27  ;;  %v450_v9 = vmul.f32 %v1492_v55, %v2016_v17  ;;  %v502_v27 = vlaneseq  ;;  %v500_v17 = vld [vmem:[%s2203_s2] sm:$0x3] }
 0x129   : > { %1273 = vmatpush3.bf16.msra.mxu1 %v1460_v25 }
 0x12a   : > { %v467_v7 = vpack.c.bf16 %v451_v49, %v449_v0  ;;  %v466_v8 = vpack.c.bf16 %v450_v9, %v448_v4  ;;  %v503_v51 = vshrl.u32 %v502_v27, 7 }
 0x12c   : > { %735 = vmatmul.mubr.bf16.gmra.mrb[12].mxu0 %v458_v22  ;;  %v504_v52 = vsub.s32 0, %v503_v51  ;;  %v508_v21 = vsub.s32 1, %v503_v51 }
 0x12d   : > { %744 = vmatprep.mubr.bf16.mxu0 %v461_v26 }
 0x12e   : > { %v2074_v54 = vrot.slane %v500_v17, %v504_v52  ;;  %v2076_v56 = vrot.slane %v500_v17, %v508_v21 }
 0x134   : > { %745 = vmatmul.mubr.bf16.gmra.mrb[16].mxu0 %v460_v38 }
 0x135   : > { %754 = vmatprep.mubr.bf16.mxu0 %v463_v42 }
 0x13c   : > { %755 = vmatmul.mubr.bf16.gmra.mrb[20].mxu0 %v462_v46 }
 0x13d   : > { %764 = vmatprep.mubr.bf16.mxu0 %v465_v1 }
 0x144   : > { %765 = vmatmul.mubr.bf16.gmra.mrb[24].mxu0 %v464_v48 }
 0x145   : > { %774 = vmatprep.mubr.bf16.mxu0 %v467_v7 }
 0x14c   : > { %775 = vmatmul.mubr.bf16.gmra.mrb[28].mxu0 %v466_v8 }
 0x1e7   : > { %v706_v57 = vpop.f32.mrb[0].mxu0 }
 0x1e8   : > { %v707_v58 = vadd.f32 %v706_v57, %v2074_v54  ;;  %v708_v59 = vpop.f32.mrb[1].mxu0 }
 0x1e9   : > { %v709_v20 = vadd.f32 %v708_v59, %v2076_v56  ;;  %v710_v62 = vpop.f32.mrb[2].mxu0 }
 0x1ea   : > { %v711_v2 = vadd.f32 %v710_v62, %v2074_v54  ;;  %v712_v12 = vpop.f32.mrb[3].mxu0  ;;  %v785_v63 = vmax.f32 %v707_v58, 0.0 }
 0x1eb   : > { %v713_v18 = vadd.f32 %v712_v12, %v2076_v56  ;;  %v786_v6 = vmax.f32 %v709_v20, 0.0 }
 0x1ec   : > { %v787_v3 = vmax.f32 %v711_v2, 0.0 }
 0x1ed   : > { %v788_v10 = vmax.f32 %v713_v18, 0.0 }
 0x1ee   : > { %v817_v11 = vpack.c.bf16 %v787_v3, %v785_v63 }
 0x1ef   : > { %v716_v15 = vpop.f32.mrb[4].mxu0  ;;  %v818_v19 = vpack.c.bf16 %v788_v10, %v786_v6 }
 0x1f0   : > { %v717_v14 = vadd.f32 %v716_v15, %v2074_v54  ;;  %v718_v16 = vpop.f32.mrb[5].mxu0 }
 0x1f1   : > { %v719_v29 = vadd.f32 %v718_v16, %v2076_v56  ;;  %v720_v31 = vpop.f32.mrb[6].mxu0  ;;  %1000 = vmatprep.mubr.bf16.mxu1 %v818_v19 }
 0x1f2   : > { %v721_v22 = vadd.f32 %v720_v31, %v2074_v54  ;;  %v722_v23 = vpop.f32.mrb[7].mxu0  ;;  %1001 = vmatmul.mubr.bf16.vlgmr.msra.gmra.mrb[0].mxu1 %v817_v11  ;;  %v789_v26 = vmax.f32 %v717_v14, 0.0 }
 0x1f3   : > { %v723_v24 = vadd.f32 %v722_v23, %v2076_v56  ;;  %v790_v33 = vmax.f32 %v719_v29, 0.0 }
 0x1f4   : > { %v791_v32 = vmax.f32 %v721_v22, 0.0 }
 0x1f5   : > { %v792_v34 = vmax.f32 %v723_v24, 0.0 }
 0x1f6   : > { %v819_v28 = vpack.c.bf16 %v791_v32, %v789_v26 }
 0x1f7   : > { %v820_v30 = vpack.c.bf16 %v792_v34, %v790_v33  ;;  %v726_v37 = vpop.f32.mrb[8].mxu0 }
 0x1f8   : > { %v727_v41 = vadd.f32 %v726_v37, %v2074_v54  ;;  %v728_v36 = vpop.f32.mrb[9].mxu0 }
 0x1f9   : > { %v729_v38 = vadd.f32 %v728_v36, %v2076_v56  ;;  %v730_v39 = vpop.f32.mrb[10].mxu0  ;;  %1008 = vmatprep.mubr.bf16.mxu1 %v820_v30 }
 0x1fa   : > { %v731_v42 = vadd.f32 %v730_v39, %v2074_v54  ;;  %v732_v43 = vpop.f32.mrb[11].mxu0  ;;  %1009 = vmatmul.mubr.bf16.gmra.mrb[4].mxu1 %v819_v28  ;;  %v793_v45 = vmax.f32 %v727_v41, 0.0 }
 0x1fb   : > { %v733_v44 = vadd.f32 %v732_v43, %v2076_v56  ;;  %v794_v40 = vmax.f32 %v729_v38, 0.0 }
 0x1fc   : > { %v795_v35 = vmax.f32 %v731_v42, 0.0 }
 0x1fd   : > { %v796_v46 = vmax.f32 %v733_v44, 0.0 }
 0x1fe   : > { %v821_v53 = vpack.c.bf16 %v795_v35, %v793_v45 }
 0x1ff   : > { %v822_v1 = vpack.c.bf16 %v796_v46, %v794_v40  ;;  %v736_v55 = vpop.f32.mrb[12].mxu0 }
 0x200   : > { %v737_v5 = vadd.f32 %v736_v55, %v2074_v54  ;;  %v738_v47 = vpop.f32.mrb[13].mxu0 }
 0x201   : > { %v739_v0 = vadd.f32 %v738_v47, %v2076_v56  ;;  %v740_v49 = vpop.f32.mrb[14].mxu0  ;;  %1016 = vmatprep.mubr.bf16.mxu1 %v822_v1 }
 0x202   : > { %v741_v48 = vadd.f32 %v740_v49, %v2074_v54  ;;  %v742_v7 = vpop.f32.mrb[15].mxu0  ;;  %1017 = vmatmul.mubr.bf16.gmra.mrb[8].mxu1 %v821_v53  ;;  %v797_v9 = vmax.f32 %v737_v5, 0.0 }
 0x203   : > { %v743_v4 = vadd.f32 %v742_v7, %v2076_v56  ;;  %v798_v13 = vmax.f32 %v739_v0, 0.0 }
 0x204   : > { %v799_v8 = vmax.f32 %v741_v48, 0.0 }
 0x205   : > { %v800_v61 = vmax.f32 %v743_v4, 0.0 }
 0x206   : > { %v823_v50 = vpack.c.bf16 %v799_v8, %v797_v9  ;;  %v2114_v8 = vld [vmem:[%s2205_s4] ss:$0 sm:$0xff] }
 0x207   : > { %v824_v60 = vpack.c.bf16 %v800_v61, %v798_v13  ;;  %v746_v25 = vpop.f32.mrb[16].mxu0 }
 0x208   : > { %v747_v27 = vadd.f32 %v746_v25, %v2074_v54  ;;  %v748_v51 = vpop.f32.mrb[17].mxu0 }
 0x209   : > { %v749_v52 = vadd.f32 %v748_v51, %v2076_v56  ;;  %v750_v17 = vpop.f32.mrb[18].mxu0  ;;  %1024 = vmatprep.mubr.bf16.mxu1 %v824_v60 }
 0x20a   : > { %v751_v21 = vadd.f32 %v750_v17, %v2074_v54  ;;  %v752_v57 = vpop.f32.mrb[19].mxu0  ;;  %1025 = vmatmul.mubr.bf16.gmra.mrb[12].mxu1 %v823_v50  ;;  %v801_v59 = vmax.f32 %v747_v27, 0.0 }
 0x20b   : > { %v753_v58 = vadd.f32 %v752_v57, %v2076_v56  ;;  %v802_v62 = vmax.f32 %v749_v52, 0.0 }
 0x20c   : > { %v803_v20 = vmax.f32 %v751_v21, 0.0 }
 0x20d   : > { %v804_v2 = vmax.f32 %v753_v58, 0.0 }
 0x20e   : > { %v825_v12 = vpack.c.bf16 %v803_v20, %v801_v59 }
 0x20f   : > { %v826_v18 = vpack.c.bf16 %v804_v2, %v802_v62  ;;  %v756_v63 = vpop.f32.mrb[20].mxu0 }
 0x210   : > { %v757_v3 = vadd.f32 %v756_v63, %v2074_v54  ;;  %v758_v6 = vpop.f32.mrb[21].mxu0 }
 0x211   : > { %v759_v10 = vadd.f32 %v758_v6, %v2076_v56  ;;  %v760_v11 = vpop.f32.mrb[22].mxu0  ;;  %1032 = vmatprep.mubr.bf16.mxu1 %v826_v18 }
 0x212   : > { %v761_v15 = vadd.f32 %v760_v11, %v2074_v54  ;;  %v762_v19 = vpop.f32.mrb[23].mxu0  ;;  %1033 = vmatmul.mubr.bf16.gmra.mrb[16].mxu1 %v825_v12  ;;  %v805_v16 = vmax.f32 %v757_v3, 0.0 }
 0x213   : > { %v763_v14 = vadd.f32 %v762_v19, %v2076_v56  ;;  %v806_v31 = vmax.f32 %v759_v10, 0.0 }
 0x214   : > { %v807_v29 = vmax.f32 %v761_v15, 0.0 }
 0x215   : > { %v808_v22 = vmax.f32 %v763_v14, 0.0 }
 0x216   : > { %v827_v23 = vpack.c.bf16 %v807_v29, %v805_v16 }
 0x217   : > { %v828_v24 = vpack.c.bf16 %v808_v22, %v806_v31  ;;  %v766_v26 = vpop.f32.mrb[24].mxu0 }
 0x218   : > { %v767_v32 = vadd.f32 %v766_v26, %v2074_v54  ;;  %v768_v33 = vpop.f32.mrb[25].mxu0 }
 0x219   : > { %v769_v34 = vadd.f32 %v768_v33, %v2076_v56  ;;  %v770_v28 = vpop.f32.mrb[26].mxu0  ;;  %1040 = vmatprep.mubr.bf16.mxu1 %v828_v24 }
 0x21a   : > { %v771_v30 = vadd.f32 %v770_v28, %v2074_v54  ;;  %v772_v37 = vpop.f32.mrb[27].mxu0  ;;  %1041 = vmatmul.mubr.bf16.gmra.mrb[20].mxu1 %v827_v23  ;;  %v809_v36 = vmax.f32 %v767_v32, 0.0 }
 0x21b   : > { %v773_v41 = vadd.f32 %v772_v37, %v2076_v56  ;;  %v810_v39 = vmax.f32 %v769_v34, 0.0 }
 0x21c   : > { %v811_v38 = vmax.f32 %v771_v30, 0.0 }
 0x21d   : > { %v812_v42 = vmax.f32 %v773_v41, 0.0 }
 0x21e   : > { %v829_v43 = vpack.c.bf16 %v811_v38, %v809_v36 }
 0x21f   : > { %v830_v44 = vpack.c.bf16 %v812_v42, %v810_v39  ;;  %v776_v45 = vpop.f32.mrb[28].mxu0 }
 0x220   : > { %v777_v35 = vadd.f32 %v776_v45, %v2074_v54  ;;  %v778_v40 = vpop.f32.mrb[29].mxu0 }
 0x221   : > { %v779_v46 = vadd.f32 %v778_v40, %v2076_v56  ;;  %v780_v53 = vpop.f32.mrb[30].mxu0  ;;  %1048 = vmatprep.mubr.bf16.mxu1 %v830_v44 }
 0x222   : > { %v781_v1 = vadd.f32 %v780_v53, %v2074_v54  ;;  %v782_v55 = vpop.f32.mrb[31].mxu0  ;;  %1049 = vmatmul.mubr.bf16.gmra.mrb[24].mxu1 %v829_v43  ;;  %v813_v47 = vmax.f32 %v777_v35, 0.0 }
 0x223   : > { %v783_v5 = vadd.f32 %v782_v55, %v2076_v56  ;;  %v814_v49 = vmax.f32 %v779_v46, 0.0 }
 0x224   : > { %v815_v0 = vmax.f32 %v781_v1, 0.0 }
 0x225   : > { %v816_v48 = vmax.f32 %v783_v5, 0.0 }
 0x226   : > { %v831_v7 = vpack.c.bf16 %v815_v0, %v813_v47 }
 0x227   : > { %v832_v4 = vpack.c.bf16 %v816_v48, %v814_v49 }
 0x229   : > { %1056 = vmatprep.mubr.bf16.mxu1 %v832_v4 }
 0x22a   : > { %1057 = vmatmul.mubr.bf16.gmra.mrb[28].mxu1 %v831_v7 }
 0x2c5   : > { %v1274_v9 = vpop.f32.mrb[0].mxu1 }
 0x2c6   : > { %v1275_v54 = vpop.f32.mrb[1].mxu1 }
 0x2c7   : > { %v1276_v13 = vadd.f32 %v1275_v54, %v1274_v9  ;;  %v1277_v61 = vpop.f32.mrb[2].mxu1 }
 0x2c8   : > { %v1278_v50 = vpop.f32.mrb[3].mxu1 }
 0x2c9   : > { %v1003_v56 = vadd.f32 %v1276_v13, %v2114_v8  ;;  %v1279_v60 = vadd.f32 %v1278_v50, %v1277_v61 }
 0x2cb   : > { %1065 = vst [vmem:[%s2117_s13] sm:$0xff] %v1003_v56  ;;  %v1006_v25 = vadd.f32 %v1279_v60, %v2114_v8 }
 0x2cd   : > { %1066 = vst [vmem:[%s2117_s13 + $0x8] sm:$0xff] %v1006_v25  ;;  %v1280_v27 = vpop.f32.mrb[4].mxu1 }
 0x2ce   : > { %v1281_v51 = vpop.f32.mrb[5].mxu1 }
 0x2cf   : > { %v1282_v52 = vadd.f32 %v1281_v51, %v1280_v27  ;;  %v1283_v17 = vpop.f32.mrb[6].mxu1 }
 0x2d0   : > { %v1284_v21 = vpop.f32.mrb[7].mxu1 }
 0x2d1   : > { %v1011_v57 = vadd.f32 %v1282_v52, %v2114_v8  ;;  %v1285_v58 = vadd.f32 %v1284_v21, %v1283_v17 }
 0x2d3   : > { %1067 = vst [vmem:[%s2117_s13 + $0x10] sm:$0xff] %v1011_v57  ;;  %v1014_v59 = vadd.f32 %v1285_v58, %v2114_v8 }
 0x2d5   : > { %1068 = vst [vmem:[%s2117_s13 + $0x18] sm:$0xff] %v1014_v59  ;;  %v1286_v20 = vpop.f32.mrb[8].mxu1 }
 0x2d6   : > { %v1287_v62 = vpop.f32.mrb[9].mxu1 }
 0x2d7   : > { %v1288_v2 = vadd.f32 %v1287_v62, %v1286_v20  ;;  %v1289_v12 = vpop.f32.mrb[10].mxu1 }
 0x2d8   : > { %v1290_v18 = vpop.f32.mrb[11].mxu1 }
 0x2d9   : > { %v1019_v63 = vadd.f32 %v1288_v2, %v2114_v8  ;;  %v1291_v3 = vadd.f32 %v1290_v18, %v1289_v12 }
 0x2db   : > { %1069 = vst [vmem:[%s2117_s13 + $0x20] sm:$0xff] %v1019_v63  ;;  %v1022_v6 = vadd.f32 %v1291_v3, %v2114_v8 }
 0x2dd   : > { %1070 = vst [vmem:[%s2117_s13 + $0x28] sm:$0xff] %v1022_v6  ;;  %v1292_v10 = vpop.f32.mrb[12].mxu1 }
 0x2de   : > { %v1293_v11 = vpop.f32.mrb[13].mxu1 }
 0x2df   : > { %v1294_v15 = vadd.f32 %v1293_v11, %v1292_v10  ;;  %v1295_v19 = vpop.f32.mrb[14].mxu1 }
 0x2e0   : > { %v1296_v14 = vpop.f32.mrb[15].mxu1 }
 0x2e1   : > { %v1027_v16 = vadd.f32 %v1294_v15, %v2114_v8  ;;  %v1297_v29 = vadd.f32 %v1296_v14, %v1295_v19 }
 0x2e3   : > { %1071 = vst [vmem:[%s2117_s13 + $0x30] sm:$0xff] %v1027_v16  ;;  %v1030_v31 = vadd.f32 %v1297_v29, %v2114_v8 }
 0x2e5   : > { %1072 = vst [vmem:[%s2117_s13 + $0x38] sm:$0xff] %v1030_v31  ;;  %v1298_v22 = vpop.f32.mrb[16].mxu1 }
 0x2e6   : > { %v1299_v23 = vpop.f32.mrb[17].mxu1 }
 0x2e7   : > { %v1300_v24 = vadd.f32 %v1299_v23, %v1298_v22  ;;  %v1301_v26 = vpop.f32.mrb[18].mxu1 }
 0x2e8   : > { %v1302_v32 = vpop.f32.mrb[19].mxu1 }
 0x2e9   : > { %v1035_v33 = vadd.f32 %v1300_v24, %v2114_v8  ;;  %v1303_v34 = vadd.f32 %v1302_v32, %v1301_v26 }
 0x2eb   : > { %1073 = vst [vmem:[%s2117_s13 + $0x40] sm:$0xff] %v1035_v33  ;;  %v1038_v28 = vadd.f32 %v1303_v34, %v2114_v8 }
 0x2ed   : > { %1074 = vst [vmem:[%s2117_s13 + $0x48] sm:$0xff] %v1038_v28  ;;  %v1304_v30 = vpop.f32.mrb[20].mxu1 }
 0x2ee   : > { %v1305_v37 = vpop.f32.mrb[21].mxu1 }
 0x2ef   : > { %v1306_v41 = vadd.f32 %v1305_v37, %v1304_v30  ;;  %v1307_v36 = vpop.f32.mrb[22].mxu1 }
 0x2f0   : > { %v1308_v38 = vpop.f32.mrb[23].mxu1 }
 0x2f1   : > { %v1043_v39 = vadd.f32 %v1306_v41, %v2114_v8  ;;  %v1309_v42 = vadd.f32 %v1308_v38, %v1307_v36 }
 0x2f3   : > { %1075 = vst [vmem:[%s2117_s13 + $0x50] sm:$0xff] %v1043_v39  ;;  %v1046_v43 = vadd.f32 %v1309_v42, %v2114_v8 }
 0x2f5   : > { %1076 = vst [vmem:[%s2117_s13 + $0x58] sm:$0xff] %v1046_v43  ;;  %v1310_v44 = vpop.f32.mrb[24].mxu1 }
 0x2f6   : > { %v1311_v45 = vpop.f32.mrb[25].mxu1 }
 0x2f7   : > { %v1312_v35 = vadd.f32 %v1311_v45, %v1310_v44  ;;  %v1313_v40 = vpop.f32.mrb[26].mxu1 }
 0x2f8   : > { %v1314_v46 = vpop.f32.mrb[27].mxu1 }
 0x2f9   : > { %v1051_v53 = vadd.f32 %v1312_v35, %v2114_v8  ;;  %v1315_v1 = vadd.f32 %v1314_v46, %v1313_v40 }
 0x2fb   : > { %1077 = vst [vmem:[%s2117_s13 + $0x60] sm:$0xff] %v1051_v53  ;;  %v1054_v55 = vadd.f32 %v1315_v1, %v2114_v8 }
 0x2fd   : > { %1078 = vst [vmem:[%s2117_s13 + $0x68] sm:$0xff] %v1054_v55  ;;  %v1316_v5 = vpop.f32.mrb[28].mxu1 }
 0x2fe   : > { %v1317_v47 = vpop.f32.mrb[29].mxu1 }
 0x2ff   : > { %v1318_v0 = vadd.f32 %v1317_v47, %v1316_v5  ;;  %v1319_v49 = vpop.f32.mrb[30].mxu1 }
 0x300   : > { %v1320_v48 = vpop.f32.mrb[31].mxu1 }
 0x301   : > { %v1059_v7 = vadd.f32 %v1318_v0, %v2114_v8  ;;  %v1321_v4 = vadd.f32 %v1320_v48, %v1319_v49 }
 0x303   : > { %1079 = vst [vmem:[%s2117_s13 + $0x70] sm:$0xff] %v1059_v7  ;;  %v1062_v9 = vadd.f32 %v1321_v4, %v2114_v8 }
 0x305   : > { %1080 = vst [vmem:[%s2117_s13 + $0x78] sm:$0xff] %v1062_v9 }
 0x306   : > { %1592 = shalt.err (!%p1589_p2)
}
 0x307   : > { %s1593_s24 = scalar_lea.hbm %s2152_s14, 2048  ;;  %s1597_s28 = scalar_lea.hbm %s2206_s5, 4096 }
 0x308   : > { %p1594_p13 = scmp.ne.s32.totalorder %s2152_s14, %s1593_s24  ;;  %p1598_p4 = scmp.lt.u32.totalorder %s2152_s14, %s2206_s5 }
 0x309   : > { %p1599_p7 = scmp.lt.u32.totalorder %s1597_s28, %s1593_s24  ;;  %p1601_p11 = scmp.lt.u32.totalorder %s1593_s24, %s2152_s14 }
 0x30a   : > { %p1595_p6 = pnand %p1594_p13, %p2220_p0 }
 0x30b   : > { %p1600_p8 = por %p1599_p7, %p1598_p4 }
 0x30c   : > { %p1596_p10 = pneg %p1595_p6 }
 0x30d   : > { %p1602_p1 = por %p1601_p11, %p1600_p8 }
 0x30f   : > { %p1603_p3 = pnand %p1602_p1, %p1596_p10 }
 0x311   : > { %1606 = shalt.err (!%p1603_p3)
}
 0x312   : > { %s1661_s29 = smov 128   ;;  %s1662_s9 = smov 8  }
 0x313   : > { %1332 = dma.vmem_to_hbm [thread:$0]  (%p2220_p0), %s2154_s8, 2048, %s2152_s14, %s1082_s22, %s1661_s29, %s1661_s29, %s1662_s9  }
 0x314 PF: > { %s1110_s11 = sand.u32 1, %s1637_s18   ;;  %p2221_p5 = scmp.ne.s32.totalorder %s2211_s25, 0 }
 0x315   : > { %p2222_p9 = scmp.ge.s32.totalorder %s1649_s21, 2  ;;  %s1111_s15 = scalar_lea.sflag [#allocation4], %s1110_s11 }
 0x317   : > { %p1346_p12 = pnand %p2222_p9, %p2221_p5 }
 0x319   : > { %1632 = dma.done.wait (!%p1346_p12), %s1111_s15, 2048  }
 0x31a   : > { %1634 = vsyncadd (!%p1346_p12), %s1111_s15, 4294965248  ;;  %p19_p2 = scmp.ge.s32.totalorder %s1803_s16, 4   ;;  %s2223_s18 = smov %s1641_s19 }
 0x31b   : > { %s2224_s19 = smov %s1645_s20  ;;  %s2225_s20 = smov %s1812_s27 }
 0x31c   : > { %s2226_s21 = smov %s1803_s16  ;;  %21 = sbr.rel (!%p19_p2) target bundleno = 6 (0x6), region = 93 }
 0x323   :  { %1116 = vsyncpa [#allocation3], 1 }
 0x324   :  { %1118 = vsyncpa [#allocation3 + $0x1], 1 }
 0x325   :  { %1119 = vsyncpa [#allocation6], 1 }
 0x326   :  { %1120 = vsyncpa [#allocation4], 1 }
 0x327   :  { %1122 = vsyncpa [#allocation4 + $0x1], 1 }

</bundles_post_ra>
